<compile_context>
chip_gen: v7x
topology: tpu7x:2x2x1
jax: 0.10.0
libtpu: 0.0.40
codegen_flags: <defaults>
</compile_context>

<pallas_src>
import numpy as np

import jax
import jax.numpy as jnp
from jax import lax
from jax.experimental import pallas as pl
from jax.experimental.pallas import tpu as pltpu


# ----------------------------- Pallas kernel -------------------------------

def _lenet_kernel(x_ref, w1_ref, b1_ref, w2_ref, b2_ref,
                  w1h_ref, fb1_ref, wfc2_ref, fb2_ref, out_ref):
    NB = x_ref.shape[1]            # batch rows in this grid step (static)
    f32, bf16 = jnp.float32, jnp.bfloat16

    # ---------------- conv1 (5x5, 1->10) + MaxPool2d(2) + ReLU ----------------
    # Banded GEMM over W; one 256-lane matmul per ki (even|odd pool columns
    # packed in lanes [0:128) | [128:256)).  Rows are (h_out, n).
    y1 = jnp.zeros((24 * NB, 256), f32)
    for ki in range(5):
        xs = x_ref[pl.ds(ki, 24), :, :].reshape(24 * NB, 28)     # bf16, no cast
        y1 = y1 + jnp.dot(xs, w1_ref[ki], preferred_element_type=f32)
    wm = jnp.maximum(y1[:, :128], y1[:, 128:])                   # max over W pairs
    wm = wm.reshape(12, 2, NB, 128)
    p1 = jnp.maximum(wm[:, 0], wm[:, 1])                         # max over H pairs
    p1 = jnp.maximum(p1 + b1_ref[...], 0.0)                      # (12, NB, 128)

    # ---------------- conv2 (5x5, 10->20) + MaxPool2d(2) + ReLU ---------------
    # TODO(synk): Dropout2d(0.5) / Dropout(0.5) are identity (eval-mode semantics).
    p1b = p1.astype(bf16)
    y2 = jnp.zeros((8 * NB, 256), f32)
    for ki in range(5):
        ps = p1b[ki:ki + 8].reshape(8 * NB, 128)
        y2 = y2 + jnp.dot(ps, w2_ref[ki], preferred_element_type=f32)
    wm2 = jnp.maximum(y2[:, :128], y2[:, 128:]).reshape(4, 2, NB, 128)
    p2 = jnp.maximum(wm2[:, 0], wm2[:, 1])
    p2 = jnp.maximum(p2 + b2_ref[...], 0.0)                      # (4, NB, 128)

    # ---------------- fc1 (320->50, padded to 128) + ReLU, fc2 (50->10) -------
    p2b = p2.astype(bf16)
    z = jnp.zeros((NB, 128), f32)
    for h in range(4):                                           # sum over pooled-H slices
        z = z + jnp.dot(p2b[h], w1h_ref[h], preferred_element_type=f32)
    z = jnp.maximum(z + fb1_ref[...], 0.0)
    logits = jnp.dot(z.astype(bf16), wfc2_ref[...], preferred_element_type=f32)
    out_ref[...] = (logits + fb2_ref[...]).astype(out_ref.dtype)  # lane-dense (NB,128)


# ----------------------- parameter init / preprocessing --------------------

def init_params(key):
    """PyTorch-shaped parameters (what nn.Module would hold)."""
    ks = jax.random.split(key, 8)

    def u(k, shape, fan_in):
        bound = 1.0 / float(fan_in) ** 0.5
        return jax.random.uniform(k, shape, jnp.float32, -bound, bound)

    return {
        "conv1_w": u(ks[0], (10, 1, 5, 5), 25),
        "conv1_b": u(ks[1], (10,), 25),
        "conv2_w": u(ks[2], (20, 10, 5, 5), 250),
        "conv2_b": u(ks[3], (20,), 250),
        "fc1_w":   u(ks[4], (50, 320), 320),
        "fc1_b":   u(ks[5], (50,), 320),
        "fc2_w":   u(ks[6], (10, 50), 50),
        "fc2_b":   u(ks[7], (10,), 50),
    }


def prepare_params(params):
    """One-time host-side weight preprocessing (hoisted out of the forward)."""
    w1 = np.asarray(params["conv1_w"], np.float32)   # (10, 1, 5, 5)
    b1 = np.asarray(params["conv1_b"], np.float32)
    w2 = np.asarray(params["conv2_w"], np.float32)   # (20, 10, 5, 5)
    b2 = np.asarray(params["conv2_b"], np.float32)
    f1w = np.asarray(params["fc1_w"], np.float32)    # (50, 320)
    f1b = np.asarray(params["fc1_b"], np.float32)
    f2w = np.asarray(params["fc2_w"], np.float32)    # (10, 50)
    f2b = np.asarray(params["fc2_b"], np.float32)

    # conv1 as banded GEMM over the 28-wide W axis:
    #   B1[ki, j, c, w] = w1[c, 0, ki, j - w]  for 0 <= j - w < 5.
    B1 = np.zeros((5, 28, 10, 24), np.float32)
    for ki in range(5):
        for kj in range(5):
            for w in range(24):
                B1[ki, w + kj, :, w] = w1[:, 0, ki, kj]
    B1e = B1[:, :, :, 0::2].reshape(5, 28, 120)      # lanes = c*12 + w_pooled
    B1o = B1[:, :, :, 1::2].reshape(5, 28, 120)
    # pack even|odd into one 256-lane weight (each half zero-padded 120 -> 128)
    W1 = np.zeros((5, 28, 256), np.float32)
    W1[:, :, :120] = B1e
    W1[:, :, 128:248] = B1o
    bias1 = np.zeros((1, 128), np.float32)
    bias1[0, :120] = np.repeat(b1, 12)

    # conv2 as banded GEMM over (cin, W_pooled): contraction rows = cin*12 + j.
    B2 = np.zeros((5, 10, 12, 20, 8), np.float32)    # [ki, cin, j, co, w]
    for ki in range(5):
        for kj in range(5):
            for w in range(8):
                B2[ki, :, w + kj, :, w] = w2[:, :, ki, kj].T   # (cin, co)
    B2 = B2.reshape(5, 120, 20, 8)
    B2e = B2[:, :, :, 0::2].reshape(5, 120, 80)      # lanes = co*4 + w_pooled
    B2o = B2[:, :, :, 1::2].reshape(5, 120, 80)
    W2 = np.zeros((5, 128, 256), np.float32)         # contraction padded 120 -> 128
    W2[:, :120, :80] = B2e
    W2[:, :120, 128:208] = B2o
    bias2 = np.zeros((1, 128), np.float32)
    bias2[0, :80] = np.repeat(b2, 4)

    # fc1 with PyTorch's NCHW view(-1, 320) flatten folded into the weight,
    # split by pooled-H; contraction padded 80 -> 128, output padded 50 -> 128.
    W1h_core = f1w.reshape(50, 20, 4, 4).transpose(2, 1, 3, 0).reshape(4, 80, 50)
    W1h = np.zeros((4, 128, 128), np.float32)
    W1h[:, :80, :50] = W1h_core
    fb1 = np.zeros((1, 128), np.float32)
    fb1[0, :50] = f1b

    # fc2: contraction padded 50 -> 128, output padded 10 -> 128 (lane-dense store).
    Wfc2 = np.zeros((128, 128), np.float32)
    Wfc2[:50, :10] = f2w.T
    fb2 = np.zeros((1, 128), np.float32)
    fb2[0, :10] = f2b

    bf = jnp.bfloat16
    return {
        "w1": jnp.asarray(W1, bf),   "b1": jnp.asarray(bias1, jnp.float32),
        "w2": jnp.asarray(W2, bf),   "b2": jnp.asarray(bias2, jnp.float32),
        "w1h": jnp.asarray(W1h, bf), "fb1": jnp.asarray(fb1, jnp.float32),
        "wfc2": jnp.asarray(Wfc2, bf), "fb2": jnp.asarray(fb2, jnp.float32),
    }


# --------------------------------- forward ---------------------------------

def _choose_batch_block(n):
    """Batch rows per grid step: multiple of 16, <=128, >=2 grid steps if possible."""
    npad16 = ((n + 15) // 16) * 16
    if npad16 <= 16:
        return 16
    nb = min(128, npad16 // 2)
    return max(16, (nb // 16) * 16)


def net_forward(kparams, x_nchw):
    """Eval-mode forward of Net: one fused Pallas kernel, gridded over batch."""
    N = x_nchw.shape[0]
    assert x_nchw.shape[1:] == (1, 28, 28), "view(-1, 320) implies 1x28x28 inputs"
    NB = _choose_batch_block(N)
    npad = pl.cdiv(N, NB) * NB

    # bf16 cast first (halves the bytes the transpose pass moves), pad the batch,
    # then put batch on the sublane axis: (H=28, Npad, W=28).
    x = x_nchw.reshape(N, 28, 28).astype(jnp.bfloat16)
    if npad != N:
        x = jnp.pad(x, ((0, npad - N), (0, 0), (0, 0)))
    x = jnp.transpose(x, (1, 0, 2))

    def const_spec(arr):
        zeros = (0,) * arr.ndim
        return pl.BlockSpec(arr.shape, lambda b, _z=zeros: _z)

    kp = kparams
    weight_args = (kp["w1"], kp["b1"], kp["w2"], kp["b2"],
                   kp["w1h"], kp["fb1"], kp["wfc2"], kp["fb2"])

    out = pl.pallas_call(
        _lenet_kernel,
        out_shape=jax.ShapeDtypeStruct((npad, 128), jnp.float32),
        grid=(npad // NB,),
        in_specs=[pl.BlockSpec((28, NB, 28), lambda b: (0, b, 0))]
                 + [const_spec(a) for a in weight_args],
        out_specs=pl.BlockSpec((NB, 128), lambda b: (b, 0)),
        compiler_params=pltpu.CompilerParams(
            dimension_semantics=("parallel",),
            vmem_limit_bytes=32 * 1024 * 1024),
    )(x, *weight_args)
    return out[:N, :10]


def net_forward_reference(params, x_nchw):
    """Plain-XLA f32 reference with identical (eval-mode) semantics."""
    x = x_nchw.astype(jnp.float32)
    dn = ("NCHW", "OIHW", "NCHW")

    def block(y, w, b):
        y = lax.conv_general_dilated(y, w, (1, 1), "VALID", dimension_numbers=dn)
        y = y + b.reshape(1, -1, 1, 1)
        y = lax.reduce_window(y, -jnp.inf, lax.max, (1, 1, 2, 2), (1, 1, 2, 2), "VALID")
        return jnp.maximum(y, 0.0)

    y = block(x, params["conv1_w"], params["conv1_b"])
    y = block(y, params["conv2_w"], params["conv2_b"])
    y = y.reshape(y.shape[0], 320)
    y = jnp.maximum(y @ params["fc1_w"].T + params["fc1_b"], 0.0)
    return y @ params["fc2_w"].T + params["fc2_b"]


if __name__ == "__main__":
    key = jax.random.PRNGKey(0)
    k_param, k_x, k_x2 = jax.random.split(key, 3)
    params = init_params(k_param)
    kparams = prepare_params(params)        # one-time weight preprocessing

    fwd = jax.jit(net_forward)

    # MNIST-style input; view(-1, 320) in the reference forward implies 1x28x28.
    x = jax.random.normal(k_x, (2, 1, 28, 28), dtype=jnp.float32)
    out = jax.block_until_ready(fwd(kparams, x))
    assert out.shape == (2, 10) and out.dtype == jnp.float32
    ref = net_forward_reference(params, x)
    err = float(jnp.max(jnp.abs(out - ref)))
    assert err < 3e-2, f"mismatch vs reference (batch=2): {err}"

    # a second shape that exercises a multi-step grid + batch padding
    x2 = jax.random.normal(k_x2, (40, 1, 28, 28), dtype=jnp.float32)
    out2 = jax.block_until_ready(fwd(kparams, x2))
    assert out2.shape == (40, 10)
    ref2 = net_forward_reference(params, x2)
    err2 = float(jnp.max(jnp.abs(out2 - ref2)))
    assert err2 < 3e-2, f"mismatch vs reference (batch=40): {err2}"

    print("KERNEL_OK")
</pallas_src>

<mosaic_0001>
module attributes {stable_mosaic.version = 11 : i64} {
  func.func @_lenet_kernel(%arg0: i32, %arg1: memref<28x16x28xbf16, #tpu.memory_space<vmem>>, %arg2: memref<5x28x256xbf16, #tpu.memory_space<vmem>>, %arg3: memref<1x128xf32, #tpu.memory_space<vmem>>, %arg4: memref<5x128x256xbf16, #tpu.memory_space<vmem>>, %arg5: memref<1x128xf32, #tpu.memory_space<vmem>>, %arg6: memref<4x128x128xbf16, #tpu.memory_space<vmem>>, %arg7: memref<1x128xf32, #tpu.memory_space<vmem>>, %arg8: memref<128x128xbf16, #tpu.memory_space<vmem>>, %arg9: memref<1x128xf32, #tpu.memory_space<vmem>>, %arg10: memref<16x128xf32, #tpu.memory_space<vmem>>) attributes {dimension_semantics = [#tpu.dimension_semantics<parallel>], iteration_bounds = array<i64: 1>, scalar_prefetch = 0 : i64, scratch_operands = 0 : i64, tpu.core_type = #tpu.core_type<tc>, window_params = [{transform_indices = @transform_0, window_bounds = array<i64: 28, 16, 28>}, {pipeline_mode = #tpu.pipeline_mode<synchronous>, transform_indices = @transform_1, window_bounds = array<i64: 5, 28, 256>}, {pipeline_mode = #tpu.pipeline_mode<synchronous>, transform_indices = @transform_2, window_bounds = array<i64: 1, 128>}, {pipeline_mode = #tpu.pipeline_mode<synchronous>, transform_indices = @transform_3, window_bounds = array<i64: 5, 128, 256>}, {pipeline_mode = #tpu.pipeline_mode<synchronous>, transform_indices = @transform_4, window_bounds = array<i64: 1, 128>}, {pipeline_mode = #tpu.pipeline_mode<synchronous>, transform_indices = @transform_5, window_bounds = array<i64: 4, 128, 128>}, {pipeline_mode = #tpu.pipeline_mode<synchronous>, transform_indices = @transform_6, window_bounds = array<i64: 1, 128>}, {pipeline_mode = #tpu.pipeline_mode<synchronous>, transform_indices = @transform_7, window_bounds = array<i64: 128, 128>}, {pipeline_mode = #tpu.pipeline_mode<synchronous>, transform_indices = @transform_8, window_bounds = array<i64: 1, 128>}, {transform_indices = @transform_9, window_bounds = array<i64: 16, 128>}]} {
    %cst = arith.constant 0.000000e+00 : f32
    %0 = vector.broadcast %cst : f32 to vector<384x256xf32>
    %c0 = arith.constant 0 : index
    %c0_0 = arith.constant 0 : index
    %c0_1 = arith.constant 0 : index
    %1 = vector.load %arg1[%c0, %c0_0, %c0_1] : memref<28x16x28xbf16, #tpu.memory_space<vmem>>, vector<24x16x28xbf16>
    %2 = vector.shape_cast %1 : vector<24x16x28xbf16> to vector<384x28xbf16>
    %c0_2 = arith.constant 0 : index
    %c0_3 = arith.constant 0 : index
    %c0_4 = arith.constant 0 : index
    %3 = vector.load %arg2[%c0_2, %c0_3, %c0_4] : memref<5x28x256xbf16, #tpu.memory_space<vmem>>, vector<1x28x256xbf16>
    %4 = vector.shape_cast %3 : vector<1x28x256xbf16> to vector<28x256xbf16>
    %cst_5 = arith.constant dense<0.000000e+00> : vector<384x256xf32>
    %5 = tpu.matmul %2, %4, %cst_5 {dimension_numbers = #tpu.dot_dimension_numbers<[1], [0], [0], [1], [0, 0, 1, 1], [], []>} : vector<384x28xbf16>, vector<28x256xbf16>, vector<384x256xf32> -> vector<384x256xf32>
    %6 = arith.addf %0, %5 : vector<384x256xf32>
    %c1 = arith.constant 1 : index
    %c0_6 = arith.constant 0 : index
    %c0_7 = arith.constant 0 : index
    %7 = vector.load %arg1[%c1, %c0_6, %c0_7] : memref<28x16x28xbf16, #tpu.memory_space<vmem>>, vector<24x16x28xbf16>
    %8 = vector.shape_cast %7 : vector<24x16x28xbf16> to vector<384x28xbf16>
    %c1_8 = arith.constant 1 : index
    %c0_9 = arith.constant 0 : index
    %c0_10 = arith.constant 0 : index
    %9 = vector.load %arg2[%c1_8, %c0_9, %c0_10] : memref<5x28x256xbf16, #tpu.memory_space<vmem>>, vector<1x28x256xbf16>
    %10 = vector.shape_cast %9 : vector<1x28x256xbf16> to vector<28x256xbf16>
    %cst_11 = arith.constant dense<0.000000e+00> : vector<384x256xf32>
    %11 = tpu.matmul %8, %10, %cst_11 {dimension_numbers = #tpu.dot_dimension_numbers<[1], [0], [0], [1], [0, 0, 1, 1], [], []>} : vector<384x28xbf16>, vector<28x256xbf16>, vector<384x256xf32> -> vector<384x256xf32>
    %12 = arith.addf %6, %11 : vector<384x256xf32>
    %c2 = arith.constant 2 : index
    %c0_12 = arith.constant 0 : index
    %c0_13 = arith.constant 0 : index
    %13 = vector.load %arg1[%c2, %c0_12, %c0_13] : memref<28x16x28xbf16, #tpu.memory_space<vmem>>, vector<24x16x28xbf16>
    %14 = vector.shape_cast %13 : vector<24x16x28xbf16> to vector<384x28xbf16>
    %c2_14 = arith.constant 2 : index
    %c0_15 = arith.constant 0 : index
    %c0_16 = arith.constant 0 : index
    %15 = vector.load %arg2[%c2_14, %c0_15, %c0_16] : memref<5x28x256xbf16, #tpu.memory_space<vmem>>, vector<1x28x256xbf16>
    %16 = vector.shape_cast %15 : vector<1x28x256xbf16> to vector<28x256xbf16>
    %cst_17 = arith.constant dense<0.000000e+00> : vector<384x256xf32>
    %17 = tpu.matmul %14, %16, %cst_17 {dimension_numbers = #tpu.dot_dimension_numbers<[1], [0], [0], [1], [0, 0, 1, 1], [], []>} : vector<384x28xbf16>, vector<28x256xbf16>, vector<384x256xf32> -> vector<384x256xf32>
    %18 = arith.addf %12, %17 : vector<384x256xf32>
    %c3 = arith.constant 3 : index
    %c0_18 = arith.constant 0 : index
    %c0_19 = arith.constant 0 : index
    %19 = vector.load %arg1[%c3, %c0_18, %c0_19] : memref<28x16x28xbf16, #tpu.memory_space<vmem>>, vector<24x16x28xbf16>
    %20 = vector.shape_cast %19 : vector<24x16x28xbf16> to vector<384x28xbf16>
    %c3_20 = arith.constant 3 : index
    %c0_21 = arith.constant 0 : index
    %c0_22 = arith.constant 0 : index
    %21 = vector.load %arg2[%c3_20, %c0_21, %c0_22] : memref<5x28x256xbf16, #tpu.memory_space<vmem>>, vector<1x28x256xbf16>
    %22 = vector.shape_cast %21 : vector<1x28x256xbf16> to vector<28x256xbf16>
    %cst_23 = arith.constant dense<0.000000e+00> : vector<384x256xf32>
    %23 = tpu.matmul %20, %22, %cst_23 {dimension_numbers = #tpu.dot_dimension_numbers<[1], [0], [0], [1], [0, 0, 1, 1], [], []>} : vector<384x28xbf16>, vector<28x256xbf16>, vector<384x256xf32> -> vector<384x256xf32>
    %24 = arith.addf %18, %23 : vector<384x256xf32>
    %c4 = arith.constant 4 : index
    %c0_24 = arith.constant 0 : index
    %c0_25 = arith.constant 0 : index
    %25 = vector.load %arg1[%c4, %c0_24, %c0_25] : memref<28x16x28xbf16, #tpu.memory_space<vmem>>, vector<24x16x28xbf16>
    %26 = vector.shape_cast %25 : vector<24x16x28xbf16> to vector<384x28xbf16>
    %c4_26 = arith.constant 4 : index
    %c0_27 = arith.constant 0 : index
    %c0_28 = arith.constant 0 : index
    %27 = vector.load %arg2[%c4_26, %c0_27, %c0_28] : memref<5x28x256xbf16, #tpu.memory_space<vmem>>, vector<1x28x256xbf16>
    %28 = vector.shape_cast %27 : vector<1x28x256xbf16> to vector<28x256xbf16>
    %cst_29 = arith.constant dense<0.000000e+00> : vector<384x256xf32>
    %29 = tpu.matmul %26, %28, %cst_29 {dimension_numbers = #tpu.dot_dimension_numbers<[1], [0], [0], [1], [0, 0, 1, 1], [], []>} : vector<384x28xbf16>, vector<28x256xbf16>, vector<384x256xf32> -> vector<384x256xf32>
    %30 = arith.addf %24, %29 : vector<384x256xf32>
    %31 = vector.extract_strided_slice %30 {offsets = [0, 0], sizes = [384, 128], strides = [1, 1]} : vector<384x256xf32> to vector<384x128xf32>
    %32 = vector.extract_strided_slice %30 {offsets = [0, 128], sizes = [384, 128], strides = [1, 1]} : vector<384x256xf32> to vector<384x128xf32>
    %33 = arith.maximumf %31, %32 : vector<384x128xf32>
    %34 = vector.shape_cast %33 : vector<384x128xf32> to vector<12x2x16x128xf32>
    %35 = vector.extract_strided_slice %34 {offsets = [0, 0, 0, 0], sizes = [12, 1, 16, 128], strides = [1, 1, 1, 1]} : vector<12x2x16x128xf32> to vector<12x1x16x128xf32>
    %36 = vector.shape_cast %35 : vector<12x1x16x128xf32> to vector<12x16x128xf32>
    %37 = vector.extract_strided_slice %34 {offsets = [0, 1, 0, 0], sizes = [12, 1, 16, 128], strides = [1, 1, 1, 1]} : vector<12x2x16x128xf32> to vector<12x1x16x128xf32>
    %38 = vector.shape_cast %37 : vector<12x1x16x128xf32> to vector<12x16x128xf32>
    %39 = arith.maximumf %36, %38 : vector<12x16x128xf32>
    %c0_30 = arith.constant 0 : index
    %c0_31 = arith.constant 0 : index
    %40 = vector.load %arg3[%c0_30, %c0_31] : memref<1x128xf32, #tpu.memory_space<vmem>>, vector<1x128xf32>
    %41 = vector.shape_cast %40 : vector<1x128xf32> to vector<1x1x128xf32>
    %42 = vector.broadcast %41 : vector<1x1x128xf32> to vector<12x16x128xf32>
    %43 = arith.addf %39, %42 : vector<12x16x128xf32>
    %cst_32 = arith.constant 0.000000e+00 : f32
    %44 = vector.broadcast %cst_32 : f32 to vector<12x16x128xf32>
    %45 = arith.maximumf %43, %44 : vector<12x16x128xf32>
    %46 = arith.truncf %45 : vector<12x16x128xf32> to vector<12x16x128xbf16>
    %cst_33 = arith.constant 0.000000e+00 : f32
    %47 = vector.broadcast %cst_33 : f32 to vector<128x256xf32>
    %48 = vector.extract_strided_slice %46 {offsets = [0, 0, 0], sizes = [8, 16, 128], strides = [1, 1, 1]} : vector<12x16x128xbf16> to vector<8x16x128xbf16>
    %49 = vector.shape_cast %48 : vector<8x16x128xbf16> to vector<128x128xbf16>
    %c0_34 = arith.constant 0 : index
    %c0_35 = arith.constant 0 : index
    %c0_36 = arith.constant 0 : index
    %50 = vector.load %arg4[%c0_34, %c0_35, %c0_36] : memref<5x128x256xbf16, #tpu.memory_space<vmem>>, vector<1x128x256xbf16>
    %51 = vector.shape_cast %50 : vector<1x128x256xbf16> to vector<128x256xbf16>
    %cst_37 = arith.constant dense<0.000000e+00> : vector<128x256xf32>
    %52 = tpu.matmul %49, %51, %cst_37 {dimension_numbers = #tpu.dot_dimension_numbers<[1], [0], [0], [1], [0, 0, 1, 1], [], []>} : vector<128x128xbf16>, vector<128x256xbf16>, vector<128x256xf32> -> vector<128x256xf32>
    %53 = arith.addf %47, %52 : vector<128x256xf32>
    %54 = vector.extract_strided_slice %46 {offsets = [1, 0, 0], sizes = [8, 16, 128], strides = [1, 1, 1]} : vector<12x16x128xbf16> to vector<8x16x128xbf16>
    %55 = vector.shape_cast %54 : vector<8x16x128xbf16> to vector<128x128xbf16>
    %c1_38 = arith.constant 1 : index
    %c0_39 = arith.constant 0 : index
    %c0_40 = arith.constant 0 : index
    %56 = vector.load %arg4[%c1_38, %c0_39, %c0_40] : memref<5x128x256xbf16, #tpu.memory_space<vmem>>, vector<1x128x256xbf16>
    %57 = vector.shape_cast %56 : vector<1x128x256xbf16> to vector<128x256xbf16>
    %cst_41 = arith.constant dense<0.000000e+00> : vector<128x256xf32>
    %58 = tpu.matmul %55, %57, %cst_41 {dimension_numbers = #tpu.dot_dimension_numbers<[1], [0], [0], [1], [0, 0, 1, 1], [], []>} : vector<128x128xbf16>, vector<128x256xbf16>, vector<128x256xf32> -> vector<128x256xf32>
    %59 = arith.addf %53, %58 : vector<128x256xf32>
    %60 = vector.extract_strided_slice %46 {offsets = [2, 0, 0], sizes = [8, 16, 128], strides = [1, 1, 1]} : vector<12x16x128xbf16> to vector<8x16x128xbf16>
    %61 = vector.shape_cast %60 : vector<8x16x128xbf16> to vector<128x128xbf16>
    %c2_42 = arith.constant 2 : index
    %c0_43 = arith.constant 0 : index
    %c0_44 = arith.constant 0 : index
    %62 = vector.load %arg4[%c2_42, %c0_43, %c0_44] : memref<5x128x256xbf16, #tpu.memory_space<vmem>>, vector<1x128x256xbf16>
    %63 = vector.shape_cast %62 : vector<1x128x256xbf16> to vector<128x256xbf16>
    %cst_45 = arith.constant dense<0.000000e+00> : vector<128x256xf32>
    %64 = tpu.matmul %61, %63, %cst_45 {dimension_numbers = #tpu.dot_dimension_numbers<[1], [0], [0], [1], [0, 0, 1, 1], [], []>} : vector<128x128xbf16>, vector<128x256xbf16>, vector<128x256xf32> -> vector<128x256xf32>
    %65 = arith.addf %59, %64 : vector<128x256xf32>
    %66 = vector.extract_strided_slice %46 {offsets = [3, 0, 0], sizes = [8, 16, 128], strides = [1, 1, 1]} : vector<12x16x128xbf16> to vector<8x16x128xbf16>
    %67 = vector.shape_cast %66 : vector<8x16x128xbf16> to vector<128x128xbf16>
    %c3_46 = arith.constant 3 : index
    %c0_47 = arith.constant 0 : index
    %c0_48 = arith.constant 0 : index
    %68 = vector.load %arg4[%c3_46, %c0_47, %c0_48] : memref<5x128x256xbf16, #tpu.memory_space<vmem>>, vector<1x128x256xbf16>
    %69 = vector.shape_cast %68 : vector<1x128x256xbf16> to vector<128x256xbf16>
    %cst_49 = arith.constant dense<0.000000e+00> : vector<128x256xf32>
    %70 = tpu.matmul %67, %69, %cst_49 {dimension_numbers = #tpu.dot_dimension_numbers<[1], [0], [0], [1], [0, 0, 1, 1], [], []>} : vector<128x128xbf16>, vector<128x256xbf16>, vector<128x256xf32> -> vector<128x256xf32>
    %71 = arith.addf %65, %70 : vector<128x256xf32>
    %72 = vector.extract_strided_slice %46 {offsets = [4, 0, 0], sizes = [8, 16, 128], strides = [1, 1, 1]} : vector<12x16x128xbf16> to vector<8x16x128xbf16>
    %73 = vector.shape_cast %72 : vector<8x16x128xbf16> to vector<128x128xbf16>
    %c4_50 = arith.constant 4 : index
    %c0_51 = arith.constant 0 : index
    %c0_52 = arith.constant 0 : index
    %74 = vector.load %arg4[%c4_50, %c0_51, %c0_52] : memref<5x128x256xbf16, #tpu.memory_space<vmem>>, vector<1x128x256xbf16>
    %75 = vector.shape_cast %74 : vector<1x128x256xbf16> to vector<128x256xbf16>
    %cst_53 = arith.constant dense<0.000000e+00> : vector<128x256xf32>
    %76 = tpu.matmul %73, %75, %cst_53 {dimension_numbers = #tpu.dot_dimension_numbers<[1], [0], [0], [1], [0, 0, 1, 1], [], []>} : vector<128x128xbf16>, vector<128x256xbf16>, vector<128x256xf32> -> vector<128x256xf32>
    %77 = arith.addf %71, %76 : vector<128x256xf32>
    %78 = vector.extract_strided_slice %77 {offsets = [0, 0], sizes = [128, 128], strides = [1, 1]} : vector<128x256xf32> to vector<128x128xf32>
    %79 = vector.extract_strided_slice %77 {offsets = [0, 128], sizes = [128, 128], strides = [1, 1]} : vector<128x256xf32> to vector<128x128xf32>
    %80 = arith.maximumf %78, %79 : vector<128x128xf32>
    %81 = vector.shape_cast %80 : vector<128x128xf32> to vector<4x2x16x128xf32>
    %82 = vector.extract_strided_slice %81 {offsets = [0, 0, 0, 0], sizes = [4, 1, 16, 128], strides = [1, 1, 1, 1]} : vector<4x2x16x128xf32> to vector<4x1x16x128xf32>
    %83 = vector.shape_cast %82 : vector<4x1x16x128xf32> to vector<4x16x128xf32>
    %84 = vector.extract_strided_slice %81 {offsets = [0, 1, 0, 0], sizes = [4, 1, 16, 128], strides = [1, 1, 1, 1]} : vector<4x2x16x128xf32> to vector<4x1x16x128xf32>
    %85 = vector.shape_cast %84 : vector<4x1x16x128xf32> to vector<4x16x128xf32>
    %86 = arith.maximumf %83, %85 : vector<4x16x128xf32>
    %c0_54 = arith.constant 0 : index
    %c0_55 = arith.constant 0 : index
    %87 = vector.load %arg5[%c0_54, %c0_55] : memref<1x128xf32, #tpu.memory_space<vmem>>, vector<1x128xf32>
    %88 = vector.shape_cast %87 : vector<1x128xf32> to vector<1x1x128xf32>
    %89 = vector.broadcast %88 : vector<1x1x128xf32> to vector<4x16x128xf32>
    %90 = arith.addf %86, %89 : vector<4x16x128xf32>
    %cst_56 = arith.constant 0.000000e+00 : f32
    %91 = vector.broadcast %cst_56 : f32 to vector<4x16x128xf32>
    %92 = arith.maximumf %90, %91 : vector<4x16x128xf32>
    %93 = arith.truncf %92 : vector<4x16x128xf32> to vector<4x16x128xbf16>
    %cst_57 = arith.constant 0.000000e+00 : f32
    %94 = vector.broadcast %cst_57 : f32 to vector<16x128xf32>
    %95 = vector.extract_strided_slice %93 {offsets = [0, 0, 0], sizes = [1, 16, 128], strides = [1, 1, 1]} : vector<4x16x128xbf16> to vector<1x16x128xbf16>
    %96 = vector.shape_cast %95 : vector<1x16x128xbf16> to vector<16x128xbf16>
    %c0_58 = arith.constant 0 : index
    %c0_59 = arith.constant 0 : index
    %c0_60 = arith.constant 0 : index
    %97 = vector.load %arg6[%c0_58, %c0_59, %c0_60] : memref<4x128x128xbf16, #tpu.memory_space<vmem>>, vector<1x128x128xbf16>
    %98 = vector.shape_cast %97 : vector<1x128x128xbf16> to vector<128x128xbf16>
    %cst_61 = arith.constant dense<0.000000e+00> : vector<16x128xf32>
    %99 = tpu.matmul %96, %98, %cst_61 {dimension_numbers = #tpu.dot_dimension_numbers<[1], [0], [0], [1], [0, 0, 1, 1], [], []>} : vector<16x128xbf16>, vector<128x128xbf16>, vector<16x128xf32> -> vector<16x128xf32>
    %100 = arith.addf %94, %99 : vector<16x128xf32>
    %101 = vector.extract_strided_slice %93 {offsets = [1, 0, 0], sizes = [1, 16, 128], strides = [1, 1, 1]} : vector<4x16x128xbf16> to vector<1x16x128xbf16>
    %102 = vector.shape_cast %101 : vector<1x16x128xbf16> to vector<16x128xbf16>
    %c1_62 = arith.constant 1 : index
    %c0_63 = arith.constant 0 : index
    %c0_64 = arith.constant 0 : index
    %103 = vector.load %arg6[%c1_62, %c0_63, %c0_64] : memref<4x128x128xbf16, #tpu.memory_space<vmem>>, vector<1x128x128xbf16>
    %104 = vector.shape_cast %103 : vector<1x128x128xbf16> to vector<128x128xbf16>
    %cst_65 = arith.constant dense<0.000000e+00> : vector<16x128xf32>
    %105 = tpu.matmul %102, %104, %cst_65 {dimension_numbers = #tpu.dot_dimension_numbers<[1], [0], [0], [1], [0, 0, 1, 1], [], []>} : vector<16x128xbf16>, vector<128x128xbf16>, vector<16x128xf32> -> vector<16x128xf32>
    %106 = arith.addf %100, %105 : vector<16x128xf32>
    %107 = vector.extract_strided_slice %93 {offsets = [2, 0, 0], sizes = [1, 16, 128], strides = [1, 1, 1]} : vector<4x16x128xbf16> to vector<1x16x128xbf16>
    %108 = vector.shape_cast %107 : vector<1x16x128xbf16> to vector<16x128xbf16>
    %c2_66 = arith.constant 2 : index
    %c0_67 = arith.constant 0 : index
    %c0_68 = arith.constant 0 : index
    %109 = vector.load %arg6[%c2_66, %c0_67, %c0_68] : memref<4x128x128xbf16, #tpu.memory_space<vmem>>, vector<1x128x128xbf16>
    %110 = vector.shape_cast %109 : vector<1x128x128xbf16> to vector<128x128xbf16>
    %cst_69 = arith.constant dense<0.000000e+00> : vector<16x128xf32>
    %111 = tpu.matmul %108, %110, %cst_69 {dimension_numbers = #tpu.dot_dimension_numbers<[1], [0], [0], [1], [0, 0, 1, 1], [], []>} : vector<16x128xbf16>, vector<128x128xbf16>, vector<16x128xf32> -> vector<16x128xf32>
    %112 = arith.addf %106, %111 : vector<16x128xf32>
    %113 = vector.extract_strided_slice %93 {offsets = [3, 0, 0], sizes = [1, 16, 128], strides = [1, 1, 1]} : vector<4x16x128xbf16> to vector<1x16x128xbf16>
    %114 = vector.shape_cast %113 : vector<1x16x128xbf16> to vector<16x128xbf16>
    %c3_70 = arith.constant 3 : index
    %c0_71 = arith.constant 0 : index
    %c0_72 = arith.constant 0 : index
    %115 = vector.load %arg6[%c3_70, %c0_71, %c0_72] : memref<4x128x128xbf16, #tpu.memory_space<vmem>>, vector<1x128x128xbf16>
    %116 = vector.shape_cast %115 : vector<1x128x128xbf16> to vector<128x128xbf16>
    %cst_73 = arith.constant dense<0.000000e+00> : vector<16x128xf32>
    %117 = tpu.matmul %114, %116, %cst_73 {dimension_numbers = #tpu.dot_dimension_numbers<[1], [0], [0], [1], [0, 0, 1, 1], [], []>} : vector<16x128xbf16>, vector<128x128xbf16>, vector<16x128xf32> -> vector<16x128xf32>
    %118 = arith.addf %112, %117 : vector<16x128xf32>
    %c0_74 = arith.constant 0 : index
    %c0_75 = arith.constant 0 : index
    %119 = vector.load %arg7[%c0_74, %c0_75] : memref<1x128xf32, #tpu.memory_space<vmem>>, vector<1x128xf32>
    %120 = vector.broadcast %119 : vector<1x128xf32> to vector<16x128xf32>
    %121 = arith.addf %118, %120 : vector<16x128xf32>
    %cst_76 = arith.constant 0.000000e+00 : f32
    %122 = vector.broadcast %cst_76 : f32 to vector<16x128xf32>
    %123 = arith.maximumf %121, %122 : vector<16x128xf32>
    %124 = arith.truncf %123 : vector<16x128xf32> to vector<16x128xbf16>
    %c0_77 = arith.constant 0 : index
    %c0_78 = arith.constant 0 : index
    %125 = vector.load %arg8[%c0_77, %c0_78] : memref<128x128xbf16, #tpu.memory_space<vmem>>, vector<128x128xbf16>
    %cst_79 = arith.constant dense<0.000000e+00> : vector<16x128xf32>
    %126 = tpu.matmul %124, %125, %cst_79 {dimension_numbers = #tpu.dot_dimension_numbers<[1], [0], [0], [1], [0, 0, 1, 1], [], []>} : vector<16x128xbf16>, vector<128x128xbf16>, vector<16x128xf32> -> vector<16x128xf32>
    %c0_80 = arith.constant 0 : index
    %c0_81 = arith.constant 0 : index
    %127 = vector.load %arg9[%c0_80, %c0_81] : memref<1x128xf32, #tpu.memory_space<vmem>>, vector<1x128xf32>
    %128 = vector.broadcast %127 : vector<1x128xf32> to vector<16x128xf32>
    %129 = arith.addf %126, %128 : vector<16x128xf32>
    %c0_82 = arith.constant 0 : index
    %c0_83 = arith.constant 0 : index
    %130 = vector.load %arg10[%c0_82, %c0_83] : memref<16x128xf32, #tpu.memory_space<vmem>>, vector<16x128xf32>
    tpu.vector_store %arg10[%c0_82, %c0_83], %129 {strides = array<i32>} : memref<16x128xf32, #tpu.memory_space<vmem>>, vector<16x128xf32>,
    return
  }
  func.func @transform_0(%arg0: i32) -> (i32, i32, i32) {
    %c0_i32 = arith.constant 0 : i32
    %c0_i32_0 = arith.constant 0 : i32
    %c0_i32_1 = arith.constant 0 : i32
    return %c0_i32, %arg0, %c0_i32_0 : i32, i32, i32
  }
  func.func @transform_1(%arg0: i32) -> (i32, i32, i32) {
    %c0_i32 = arith.constant 0 : i32
    %c0_i32_0 = arith.constant 0 : i32
    %c0_i32_1 = arith.constant 0 : i32
    %c0_i32_2 = arith.constant 0 : i32
    return %c0_i32, %c0_i32_0, %c0_i32_1 : i32, i32, i32
  }
  func.func @transform_2(%arg0: i32) -> (i32, i32) {
    %c0_i32 = arith.constant 0 : i32
    %c0_i32_0 = arith.constant 0 : i32
    %c0_i32_1 = arith.constant 0 : i32
    return %c0_i32, %c0_i32_0 : i32, i32
  }
  func.func @transform_3(%arg0: i32) -> (i32, i32, i32) {
    %c0_i32 = arith.constant 0 : i32
    %c0_i32_0 = arith.constant 0 : i32
    %c0_i32_1 = arith.constant 0 : i32
    %c0_i32_2 = arith.constant 0 : i32
    return %c0_i32, %c0_i32_0, %c0_i32_1 : i32, i32, i32
  }
  func.func @transform_4(%arg0: i32) -> (i32, i32) {
    %c0_i32 = arith.constant 0 : i32
    %c0_i32_0 = arith.constant 0 : i32
    %c0_i32_1 = arith.constant 0 : i32
    return %c0_i32, %c0_i32_0 : i32, i32
  }
  func.func @transform_5(%arg0: i32) -> (i32, i32, i32) {
    %c0_i32 = arith.constant 0 : i32
    %c0_i32_0 = arith.constant 0 : i32
    %c0_i32_1 = arith.constant 0 : i32
    %c0_i32_2 = arith.constant 0 : i32
    return %c0_i32, %c0_i32_0, %c0_i32_1 : i32, i32, i32
  }
  func.func @transform_6(%arg0: i32) -> (i32, i32) {
    %c0_i32 = arith.constant 0 : i32
    %c0_i32_0 = arith.constant 0 : i32
    %c0_i32_1 = arith.constant 0 : i32
    return %c0_i32, %c0_i32_0 : i32, i32
  }
  func.func @transform_7(%arg0: i32) -> (i32, i32) {
    %c0_i32 = arith.constant 0 : i32
    %c0_i32_0 = arith.constant 0 : i32
    %c0_i32_1 = arith.constant 0 : i32
    return %c0_i32, %c0_i32_0 : i32, i32
  }
  func.func @transform_8(%arg0: i32) -> (i32, i32) {
    %c0_i32 = arith.constant 0 : i32
    %c0_i32_0 = arith.constant 0 : i32
    %c0_i32_1 = arith.constant 0 : i32
    return %c0_i32, %c0_i32_0 : i32, i32
  }
  func.func @transform_9(%arg0: i32) -> (i32, i32) {
    %c0_i32 = arith.constant 0 : i32
    %c0_i32_0 = arith.constant 0 : i32
    return %arg0, %c0_i32 : i32, i32
  }
}

</mosaic_0001>

<bundles_post_ra>
// kernel: net_forward.1
= control target key start
LH: loop header
LB: loop body
LE: loop exit
PB: predicated region body
PF: predicated region fallthrough
CT: control target
= control target key end

     0   :  { %14 = vsyncpa [#allocation3], 0  ;;  %s7931_s0 = inlined_call_operand.vmem [shape: bf16[28,16,28], index: 0, kind: input, shape index: {}]   ;;  %s7932_s1 = inlined_call_operand.hbm [shape: bf16[5,28,256], index: 1, kind: input, shape index: {}]   ;;  %s7933_s2 = inlined_call_operand.vmem [shape: f32[1,128], index: 2, kind: input, shape index: {}]   ;;  %s7934_s3 = inlined_call_operand.hbm [shape: bf16[5,128,256], index: 3, kind: input, shape index: {}]   ;;  %s7935_s4 = inlined_call_operand.vmem [shape: f32[1,128], index: 4, kind: input, shape index: {}]   ;;  %s7936_s5 = inlined_call_operand.vmem [shape: bf16[4,128,128], index: 5, kind: input, shape index: {}]   ;;  %s7937_s6 = inlined_call_operand.vmem [shape: f32[1,128], index: 6, kind: input, shape index: {}]   ;;  %s7938_s7 = inlined_call_operand.vmem [shape: bf16[128,128], index: 7, kind: input, shape index: {}]   ;;  %s7939_s8 = inlined_call_operand.vmem [shape: f32[1,128], index: 8, kind: input, shape index: {}]   ;;  %s7940_s9 = inlined_call_operand.vmem [shape: f32[16,128], index: 9, kind: output, shape index: {}]  }
   0x1   :  { %15 = vsyncpa [#allocation5], 0  ;;  %s6616_s30 = smov [#allocation2]   ;;  %s6568_s13 = scalar_lea.hbm %s7932_s1, 2560 }
   0x2   :  { %s23_s10 = sshll.u32 %s6616_s30, 4  ;;  %p6569_p0 = scmp.ne.s32.totalorder %s7932_s1, %s6568_s13  ;;  %s24_s10 = int_to_ptr.vmem [resolvable:$true] %s23_s10 }
   0x3   :  { %p6572_p1 = scmp.lt.u32.totalorder %s6568_s13, %s7932_s1 }
   0x5   :  { %p6574_p2 = pnand %p6572_p1, %p6569_p0 }
   0x7   :  { %6577 = shalt.err (!%p6574_p2)
}
   0x8   :  { %s6578_s18 = scalar_lea.vmem %s24_s10, 2560  ;;  %p6583_p4 = scmp.lt.s32.totalorder %s24_s10, %s24_s10 }
   0x9   :  { %p6579_p3 = scmp.ne.s32.totalorder %s24_s10, %s6578_s18  ;;  %p6584_p5 = scmp.lt.s32.totalorder %s6578_s18, %s6578_s18 }
   0xb   :  { %p6585_p6 = por %p6584_p5, %p6583_p4 }
   0xd   :  { %p6586_p7 = pnand %p6585_p6, %p6579_p3 }
   0xf   :  { %6589 = shalt.err (!%p6586_p7)
}
  0x10   :  { %s6617_s19 = smov 128   ;;  %s6618_s20 = smov 8  }
  0x11   :  { %29 = dma.hbm_to_vmem [thread:$0]  %s7932_s1, 2560, %s24_s10, [#allocation3], %s6617_s19, %s6617_s19, %s6618_s20  }
  0x12   :  { %s6619_s23 = smov [#allocation4]   ;;  %s6590_s27 = scalar_lea.hbm %s7934_s3, 10240 }
  0x13   :  { %s37_s24 = sshll.u32 %s6619_s23, 4  ;;  %p6591_p8 = scmp.ne.s32.totalorder %s7934_s3, %s6590_s27  ;;  %s38_s24 = int_to_ptr.vmem [resolvable:$true] %s37_s24 }
  0x14   :  { %p6594_p9 = scmp.lt.u32.totalorder %s6590_s27, %s7934_s3 }
  0x16   :  { %p6596_p10 = pnand %p6594_p9, %p6591_p8 }
  0x18   :  { %6599 = shalt.err (!%p6596_p10)
}
  0x19   :  { %s6600_s12 = scalar_lea.vmem %s38_s24, 10240  ;;  %p6605_p12 = scmp.lt.s32.totalorder %s38_s24, %s38_s24 }
  0x1a   :  { %p6601_p11 = scmp.ne.s32.totalorder %s38_s24, %s6600_s12  ;;  %p6606_p13 = scmp.lt.s32.totalorder %s6600_s12, %s6600_s12 }
  0x1c   :  { %p6607_p0 = por %p6606_p13, %p6605_p12 }
  0x1e   :  { %p6608_p1 = pnand %p6607_p0, %p6601_p11 }
  0x20   :  { %6611 = shalt.err (!%p6608_p1)
}
  0x21   :  { %43 = dma.hbm_to_vmem [thread:$0]  %s7934_s3, 10240, %s38_s24, [#allocation5], %s6617_s19, %s6617_s19, %s6618_s20  }
  0x22   :  { %6612 = dma.done.wait [#allocation3], 2560  }
  0x23   :  { %6613 = vsyncadd [#allocation3], 4294964736 }
  0x24   :  { %6614 = dma.done.wait [#allocation5], 10240  }
  0x25   :  { %6615 = vsyncadd [#allocation5], 4294957056  ;;  %v7941_v0 = vmov 0   ;;  %v6255_v1 = vld [vmem:[#allocation2 + $0x4] ss:$8 sps:$4 sm:$0xff]   ;;  %vm378_vm0 = vcmask 1045504  }
  0x26   :  { %906 = vmatprep.mubr.bf16.mxu0 %v7941_v0  ;;  %417 = vmatprep.mubr.bf16.mxu1 %v7941_v0  ;;  %v6257_v2 = vld [vmem:[#allocation2] ss:$8 sps:$4 sm:$0xff]   ;;  %v6258_v3 = vld [vmem:[#allocation2 + $0x14] ss:$8 sps:$4 sm:$0x3f]   ;;  %vm305_vm1 = vcmask 228352  }
  0x27   :  { %874 = vmatprep.subr.bf16.mxu0 %v6255_v1  ;;  %v6260_v4 = vld [vmem:[#allocation2 + $0x10] ss:$8 sps:$4 sm:$0x3f]   ;;  %v6264_v6 = vld [vmem:[#allocation2 + $0x44] ss:$8 sps:$4 sm:$0xff]   ;;  %vm6622_vm2 = vmmov 0  }
  0x28   :  { %875 = vmatpush1.bf16.msra.mxu0 %v6257_v2  ;;  %v6701_v5 = vsel %vm378_vm0, %v6260_v4, 0  ;;  %v6261_v7 = vld [vmem:[%s7931_s0] sm:$0xff]   ;;  %v6265_v9 = vld [vmem:[%s7931_s0 + $0x8] sm:$0xff]   ;;  %v6273_v10 = vld [vmem:[#allocation2 + $0x54] ss:$8 sps:$4 sm:$0x3f]  }
  0x29   :  { %5087 = vmatprep.subr.msk.bf16.mxu0 %vm378_vm0, %v6258_v3  ;;  %v6262_v8 = vld [vmem:[#allocation2 + $0x40] ss:$8 sps:$4 sm:$0xff]   ;;  %v6275_v11 = vld [vmem:[#allocation2 + $0x50] ss:$8 sps:$4 sm:$0x3f]  }
  0x2a   :  { %v1412_v12 = vsel %vm378_vm0, %v6275_v11, 0  ;;  %v6266_v13 = vld [vmem:[%s7931_s0 + $0x10] sm:$0xff]   ;;  %v6287_v14 = vld [vmem:[#allocation2 + $0x64] ss:$8 sps:$4 sm:$0xff]   ;;  %v6267_v15 = vld [vmem:[%s7931_s0 + $0x18] sm:$0xff]  }
  0x2b   :  { %v6268_v16 = vld [vmem:[%s7931_s0 + $0x20] sm:$0xff]   ;;  %v6269_v17 = vld [vmem:[%s7931_s0 + $0x28] sm:$0xff]   ;;  %v6270_v18 = vld [vmem:[%s7931_s0 + $0x30] sm:$0xff]  }
  0x2c   :  { %877 = vmatpush1.bf16.msra.mxu0 %v6701_v5  ;;  %v6271_v19 = vld [vmem:[%s7931_s0 + $0x38] sm:$0xff]   ;;  %v6272_v20 = vld [vmem:[%s7931_s0 + $0x40] sm:$0xff]   ;;  %v6276_v21 = vld [vmem:[%s7931_s0 + $0x48] sm:$0xff]  }
  0x2d   :  { %1417 = vmatprep.subr.bf16.mxu0 %v6264_v6  ;;  %v6277_v22 = vld [vmem:[%s7931_s0 + $0x50] sm:$0xff]   ;;  %v6278_v23 = vld [vmem:[%s7931_s0 + $0x58] sm:$0xff]   ;;  %v6279_v24 = vld [vmem:[%s7931_s0 + $0x60] sm:$0xff]  }
  0x2e   :  { %v6280_v25 = vld [vmem:[%s7931_s0 + $0x68] sm:$0xff]   ;;  %v6281_v26 = vld [vmem:[%s7931_s0 + $0x70] sm:$0xff]   ;;  %v6282_v27 = vld [vmem:[%s7931_s0 + $0x78] sm:$0xff]  }
  0x2f   :  { %5088 = vmatmul.mubr.msk.bf16.vlgmr.msra.gmra.mrb[0].mxu0 %vm305_vm1, %v6261_v7  ;;  %v6283_v28 = vld [vmem:[%s7931_s0 + $0x80] sm:$0xff]   ;;  %v6284_v29 = vld [vmem:[%s7931_s0 + $0x10] sm:$0xff]   ;;  %v6288_v34 = vld [vmem:[%s7931_s0 + $0x18] sm:$0xff]  }
  0x30   :  { %1418 = vmatpush1.bf16.msra.mxu0 %v6262_v8  ;;  %916 = vmatprep.mubr.bf16.mxu0 %v7941_v0  ;;  %v6285_v30 = vld [vmem:[#allocation2 + $0x60] ss:$8 sps:$4 sm:$0xff]   ;;  %v6302_v31 = vld [vmem:[#allocation2 + $0x70] ss:$8 sps:$4 sm:$0x3f]  }
  0x31   :  { %5188 = vmatprep.subr.msk.bf16.mxu0 %vm378_vm0, %v6273_v10  ;;  %v6300_v32 = vld [vmem:[#allocation2 + $0x74] ss:$8 sps:$4 sm:$0x3f]   ;;  %v2051_v33 = vsel %vm378_vm0, %v6302_v31, 0  ;;  %v6289_v35 = vld [vmem:[%s7931_s0 + $0x20] sm:$0xff]   ;;  %v6290_v36 = vld [vmem:[%s7931_s0 + $0x28] sm:$0xff]  }
  0x32   :  { %v6291_v37 = vld [vmem:[%s7931_s0 + $0x30] sm:$0xff]   ;;  %v6292_v38 = vld [vmem:[%s7931_s0 + $0x38] sm:$0xff]   ;;  %v6293_v39 = vld [vmem:[%s7931_s0 + $0x40] sm:$0xff]  }
  0x33   :  { %v6294_v40 = vld [vmem:[%s7931_s0 + $0x48] sm:$0xff]   ;;  %v6295_v41 = vld [vmem:[%s7931_s0 + $0x50] sm:$0xff]   ;;  %v6296_v43 = vld [vmem:[%s7931_s0 + $0x58] sm:$0xff]  }
  0x34   :  { %1420 = vmatpush1.bf16.msra.mxu0 %v1412_v12  ;;  %v6317_v42 = vld [vmem:[#allocation2 + $0x84] ss:$8 sps:$4 sm:$0xff]   ;;  %v6299_v46 = vld [vmem:[%s7931_s0 + $0x70] sm:$0xff]   ;;  %v6303_v47 = vld [vmem:[%s7931_s0 + $0x78] sm:$0xff]  }
  0x35   :  { %2056 = vmatprep.subr.bf16.mxu0 %v6287_v14  ;;  %v6297_v44 = vld [vmem:[%s7931_s0 + $0x60] sm:$0xff]   ;;  %v6298_v45 = vld [vmem:[%s7931_s0 + $0x68] sm:$0xff]   ;;  %v6306_v50 = vld [vmem:[%s7931_s0 + $0x90] sm:$0xff]  }
  0x36   :  { %v6304_v48 = vld [vmem:[%s7931_s0 + $0x80] sm:$0xff]   ;;  %v6305_v49 = vld [vmem:[%s7931_s0 + $0x88] sm:$0xff]   ;;  %v6307_v53 = vld [vmem:[%s7931_s0 + $0x98] sm:$0xff]  }
  0x37   :  { %5089 = vmatmul.mubr.msk.bf16.gmra.mrb[4].mxu0 %vm305_vm1, %v6265_v9  ;;  %v6326_v51 = vld [vmem:[#allocation2 + $0x24] ss:$8 sps:$4 sm:$0xff]   ;;  %v6328_v52 = vld [vmem:[#allocation2 + $0x20] ss:$8 sps:$4 sm:$0xff]   ;;  %v6335_v62 = vld [vmem:[%s7931_s0 + $0x10] sm:$0xff]  }
  0x38   :  { %926 = vmatprep.mubr.bf16.mxu0 %v7941_v0  ;;  %385 = vmatprep.subr.bf16.mxu1 %v6326_v51  ;;  %v6330_v54 = vld [vmem:[#allocation2 + $0x34] ss:$8 sps:$4 sm:$0x3f]   ;;  %v6332_v55 = vld [vmem:[#allocation2 + $0x30] ss:$8 sps:$4 sm:$0x3f]  }
  0x39   :  { %386 = vmatpush1.bf16.msra.mxu1 %v6328_v52  ;;  %v380_v56 = vsel %vm378_vm0, %v6332_v55, 0  ;;  %v6333_v57 = vld [vmem:[%s7931_s0 + $0x8] sm:$0xff]   ;;  %v6308_v59 = vld [vmem:[%s7931_s0 + $0xa0] sm:$0xff]   ;;  %v6567_v61 = vld [vmem:[#allocation2 + $0x14] ss:$8 sps:$4 sm:$0x3f]  }
  0x3a   :  { %5034 = vmatprep.subr.msk.bf16.mxu1 %vm378_vm0, %v6330_v54  ;;  %v6565_v58 = vld [vmem:[#allocation2 + $0x4] ss:$8 sps:$4 sm:$0xff]   ;;  %v6566_v60 = vld [vmem:[#allocation2] ss:$8 sps:$4 sm:$0xff]   ;;  %v6337_v1 = vld [vmem:[%s7931_s0 + $0x18] sm:$0xff]  }
  0x3b   :  { %v6309_v63 = vld [vmem:[%s7931_s0 + $0xa8] sm:$0xff]   ;;  %v6310_v2 = vld [vmem:[%s7931_s0 + $0xb0] sm:$0xff]   ;;  %v6342_v3 = vld [vmem:[%s7931_s0 + $0x20] sm:$0xff]  }
  0x3c   :  { %v6311_v4 = vld [vmem:[%s7931_s0 + $0xb8] sm:$0xff]   ;;  %v6312_v6 = vld [vmem:[%s7931_s0 + $0xc0] sm:$0xff]   ;;  %v6346_v7 = vld [vmem:[%s7931_s0 + $0x30] sm:$0xff]  }
  0x3d   :  { %388 = vmatpush1.bf16.msra.mxu1 %v380_v56  ;;  %v6313_v8 = vld [vmem:[%s7931_s0 + $0xc8] sm:$0xff]   ;;  %v6348_v9 = vld [vmem:[%s7931_s0 + $0x38] sm:$0xff]   ;;  %v6350_v14 = vld [vmem:[%s7931_s0 + $0x40] sm:$0xff]  }
  0x3e   :  { %5732 = vmatprep.subr.bf16.mxu1 %v6565_v58  ;;  %v6314_v10 = vld [vmem:[%s7931_s0 + $0x18] sm:$0xff]   ;;  %v6315_v11 = vld [vmem:[#allocation2 + $0x80] ss:$8 sps:$4 sm:$0xff]   ;;  %v6386_v51 = vld [vmem:[%s7931_s0 + $0x90] sm:$0xff]  }
  0x3f   :  { %5090 = vmatmul.mubr.msk.bf16.gmra.mrb[8].mxu0 %vm305_vm1, %v6266_v13  ;;  %v6339_v12 = vld [vmem:[#allocation2 + $0x94] ss:$8 sps:$4 sm:$0x3f]   ;;  %v6341_v13 = vld [vmem:[#allocation2 + $0x90] ss:$8 sps:$4 sm:$0x3f]  }
  0x40   :  { %936 = vmatprep.mubr.bf16.mxu0 %v7941_v0  ;;  %5035 = vmatmul.mubr.msk.bf16.vlgmr.msra.gmra.mrb[0].mxu1 %vm305_vm1, %v6333_v57  ;;  %v6366_v31 = vld [vmem:[%s7931_s0 + $0x80] sm:$0xff]   ;;  %v6355_v52 = vld [vmem:[%s7931_s0 + $0xb0] sm:$0xff]   ;;  %v6357_v54 = vld [vmem:[%s7931_s0 + $0xb8] sm:$0xff]  }
  0x41   :  { %427 = vmatprep.mubr.bf16.mxu1 %v7941_v0  ;;  %5734 = vmatpush1.bf16.msra.mxu1 %v6566_v60  ;;  %v6390_v55 = vld [vmem:[%s7931_s0 + $0xa0] sm:$0xff]   ;;  %v6392_v57 = vld [vmem:[%s7931_s0 + $0xa8] sm:$0xff]   ;;  %v6363_v60 = vld [vmem:[%s7931_s0 + $0xd0] sm:$0xff]  }
  0x42   :  { %5733 = vmatprep.subr.msk.bf16.mxu1 %vm378_vm0, %v6567_v61  ;;  %v6359_v56 = vld [vmem:[%s7931_s0 + $0xc0] sm:$0xff]   ;;  %v6361_v58 = vld [vmem:[%s7931_s0 + $0xc8] sm:$0xff]   ;;  %v6396_v61 = vld [vmem:[%s7931_s0 + $0xb8] sm:$0xff]  }
  0x45   :  { %5735 = vmatpush1.bf16.msra.mxu1 %v6701_v5  ;;  %v6344_v5 = vld [vmem:[%s7931_s0 + $0x28] sm:$0xff]  }
  0x47   :  { %5091 = vmatmul.mubr.msk.bf16.gmra.mrb[12].mxu0 %vm305_vm1, %v6267_v15  ;;  %v2690_v15 = vsel %vm378_vm0, %v6341_v13, 0 }
  0x48   :  { %946 = vmatprep.mubr.bf16.mxu0 %v7941_v0  ;;  %5036 = vmatmul.mubr.msk.bf16.gmra.mrb[4].mxu1 %vm305_vm1, %v6335_v62  ;;  %v6365_v62 = vld [vmem:[%s7931_s0 + $0x20] sm:$0xff]  }
  0x49   :  { %437 = vmatprep.mubr.bf16.mxu1 %v7941_v0 }
  0x4f   :  { %5092 = vmatmul.mubr.msk.bf16.gmra.mrb[16].mxu0 %vm305_vm1, %v6268_v16  ;;  %v6318_v16 = vld [vmem:[%s7931_s0 + $0x20] sm:$0xff]  }
  0x50   :  { %956 = vmatprep.mubr.bf16.mxu0 %v7941_v0  ;;  %5037 = vmatmul.mubr.msk.bf16.gmra.mrb[8].mxu1 %vm305_vm1, %v6337_v1  ;;  %v6369_v1 = vld [vmem:[%s7931_s0 + $0x30] sm:$0xff]  }
  0x51   :  { %447 = vmatprep.mubr.bf16.mxu1 %v7941_v0 }
  0x57   :  { %5093 = vmatmul.mubr.msk.bf16.gmra.mrb[20].mxu0 %vm305_vm1, %v6269_v17  ;;  %v6352_v17 = vld [vmem:[%s7931_s0 + $0x48] sm:$0xff]  }
  0x58   :  { %966 = vmatprep.mubr.bf16.mxu0 %v7941_v0  ;;  %5038 = vmatmul.mubr.msk.bf16.gmra.mrb[12].mxu1 %vm305_vm1, %v6342_v3 }
  0x59   :  { %457 = vmatprep.mubr.bf16.mxu1 %v7941_v0 }
  0x5f   :  { %5094 = vmatmul.mubr.msk.bf16.gmra.mrb[24].mxu0 %vm305_vm1, %v6270_v18  ;;  %v6319_v18 = vld [vmem:[%s7931_s0 + $0x28] sm:$0xff]  }
  0x60   :  { %976 = vmatprep.mubr.bf16.mxu0 %v7941_v0  ;;  %5039 = vmatmul.mubr.msk.bf16.gmra.mrb[16].mxu1 %vm305_vm1, %v6344_v5 }
  0x61   :  { %467 = vmatprep.mubr.bf16.mxu1 %v7941_v0 }
  0x67   :  { %5095 = vmatmul.mubr.msk.bf16.gmra.mrb[28].mxu0 %vm305_vm1, %v6271_v19  ;;  %v6354_v19 = vld [vmem:[%s7931_s0 + $0x50] sm:$0xff]  }
  0x68   :  { %986 = vmatprep.mubr.bf16.mxu0 %v7941_v0  ;;  %5040 = vmatmul.mubr.msk.bf16.gmra.mrb[20].mxu1 %vm305_vm1, %v6346_v7  ;;  %v6373_v7 = vld [vmem:[%s7931_s0 + $0x40] sm:$0xff]  }
  0x69   :  { %477 = vmatprep.mubr.bf16.mxu1 %v7941_v0 }
  0x6f   :  { %5096 = vmatmul.mubr.msk.bf16.gmra.mrb[32].mxu0 %vm305_vm1, %v6272_v20  ;;  %v6320_v20 = vld [vmem:[%s7931_s0 + $0x30] sm:$0xff]  }
  0x70   :  { %996 = vmatprep.mubr.bf16.mxu0 %v7941_v0  ;;  %5041 = vmatmul.mubr.msk.bf16.gmra.mrb[24].mxu1 %vm305_vm1, %v6348_v9 }
  0x71   :  { %487 = vmatprep.mubr.bf16.mxu1 %v7941_v0 }
  0x77   :  { %5097 = vmatmul.mubr.msk.bf16.gmra.mrb[36].mxu0 %vm305_vm1, %v6276_v21  ;;  %v6356_v21 = vld [vmem:[%s7931_s0 + $0x58] sm:$0xff]  }
  0x78   :  { %1006 = vmatprep.mubr.bf16.mxu0 %v7941_v0  ;;  %5042 = vmatmul.mubr.msk.bf16.gmra.mrb[28].mxu1 %vm305_vm1, %v6350_v14 }
  0x79   :  { %497 = vmatprep.mubr.bf16.mxu1 %v7941_v0 }
  0x7f   :  { %5098 = vmatmul.mubr.msk.bf16.gmra.mrb[40].mxu0 %vm305_vm1, %v6277_v22  ;;  %v6321_v22 = vld [vmem:[%s7931_s0 + $0x38] sm:$0xff]  }
  0x80   :  { %1016 = vmatprep.mubr.bf16.mxu0 %v7941_v0  ;;  %5043 = vmatmul.mubr.msk.bf16.gmra.mrb[32].mxu1 %vm305_vm1, %v6352_v17  ;;  %v6377_v17 = vld [vmem:[%s7931_s0 + $0x50] sm:$0xff]  }
  0x81   :  { %507 = vmatprep.mubr.bf16.mxu1 %v7941_v0 }
  0x87   :  { %5099 = vmatmul.mubr.msk.bf16.gmra.mrb[44].mxu0 %vm305_vm1, %v6278_v23  ;;  %v6358_v23 = vld [vmem:[%s7931_s0 + $0x60] sm:$0xff]  }
  0x88   :  { %1026 = vmatprep.mubr.bf16.mxu0 %v7941_v0  ;;  %5044 = vmatmul.mubr.msk.bf16.gmra.mrb[36].mxu1 %vm305_vm1, %v6354_v19 }
  0x89   :  { %517 = vmatprep.mubr.bf16.mxu1 %v7941_v0 }
  0x8f   :  { %5100 = vmatmul.mubr.msk.bf16.gmra.mrb[48].mxu0 %vm305_vm1, %v6279_v24  ;;  %v6322_v24 = vld [vmem:[%s7931_s0 + $0x40] sm:$0xff]  }
  0x90   :  { %1036 = vmatprep.mubr.bf16.mxu0 %v7941_v0  ;;  %5045 = vmatmul.mubr.msk.bf16.gmra.mrb[40].mxu1 %vm305_vm1, %v6356_v21 }
  0x91   :  { %527 = vmatprep.mubr.bf16.mxu1 %v7941_v0 }
  0x97   :  { %5101 = vmatmul.mubr.msk.bf16.gmra.mrb[52].mxu0 %vm305_vm1, %v6280_v25  ;;  %v6360_v25 = vld [vmem:[%s7931_s0 + $0x68] sm:$0xff]  }
  0x98   :  { %1046 = vmatprep.mubr.bf16.mxu0 %v7941_v0  ;;  %5046 = vmatmul.mubr.msk.bf16.gmra.mrb[44].mxu1 %vm305_vm1, %v6358_v23 }
  0x99   :  { %537 = vmatprep.mubr.bf16.mxu1 %v7941_v0 }
  0x9f   :  { %5102 = vmatmul.mubr.msk.bf16.gmra.mrb[56].mxu0 %vm305_vm1, %v6281_v26  ;;  %v6323_v26 = vld [vmem:[%s7931_s0 + $0x48] sm:$0xff]  }
  0xa0   :  { %1056 = vmatprep.mubr.bf16.mxu0 %v7941_v0  ;;  %5047 = vmatmul.mubr.msk.bf16.gmra.mrb[48].mxu1 %vm305_vm1, %v6360_v25 }
  0xa1   :  { %547 = vmatprep.mubr.bf16.mxu1 %v7941_v0 }
  0xa7   :  { %5103 = vmatmul.mubr.msk.bf16.gmra.mrb[60].mxu0 %vm305_vm1, %v6282_v27  ;;  %v6362_v27 = vld [vmem:[%s7931_s0 + $0x70] sm:$0xff]  }
  0xa8   :  { %1066 = vmatprep.mubr.bf16.mxu0 %v7941_v0  ;;  %5048 = vmatmul.mubr.msk.bf16.gmra.mrb[52].mxu1 %vm305_vm1, %v6362_v27  ;;  %v6381_v27 = vld [vmem:[%s7931_s0 + $0x60] sm:$0xff]  }
  0xa9   :  { %557 = vmatprep.mubr.bf16.mxu1 %v7941_v0 }
  0xaf   :  { %5104 = vmatmul.mubr.msk.bf16.gmra.mrb[64].mxu0 %vm305_vm1, %v6283_v28  ;;  %v6324_v28 = vld [vmem:[%s7931_s0 + $0x50] sm:$0xff]  }
  0xb0   :  { %1449 = vmatprep.mubr.bf16.mxu0 %v7941_v0 }
  0xb7   :  { %5189 = vmatmul.mubr.msk.bf16.vlgmr.msra.gmra.mrb[0].mxu0 %vm305_vm1, %v6284_v29  ;;  %v6364_v29 = vld [vmem:[%s7931_s0 + $0x78] sm:$0xff]  }
  0xb8   :  { %2057 = vmatpush1.bf16.msra.mxu0 %v6285_v30  ;;  %1459 = vmatprep.mubr.bf16.mxu0 %v7941_v0  ;;  %v6325_v30 = vld [vmem:[%s7931_s0 + $0x58] sm:$0xff]  }
  0xb9   :  { %5289 = vmatprep.subr.msk.bf16.mxu0 %vm378_vm0, %v6300_v32  ;;  %5049 = vmatmul.mubr.msk.bf16.gmra.mrb[56].mxu1 %vm305_vm1, %v6364_v29  ;;  %v6329_v32 = vld [vmem:[%s7931_s0 + $0x60] sm:$0xff]  }
  0xba   :  { %567 = vmatprep.mubr.bf16.mxu1 %v7941_v0 }
  0xbc   :  { %2059 = vmatpush1.bf16.msra.mxu0 %v2051_v33  ;;  %v6368_v33 = vld [vmem:[%s7931_s0 + $0x88] sm:$0xff]  }
  0xbd   :  { %2695 = vmatprep.subr.bf16.mxu0 %v6317_v42  ;;  %v6345_v42 = vld [vmem:[%s7931_s0 + $0x88] sm:$0xff]  }
  0xbf   :  { %5190 = vmatmul.mubr.msk.bf16.gmra.mrb[4].mxu0 %vm305_vm1, %v6288_v34  ;;  %v6334_v34 = vld [vmem:[%s7931_s0 + $0x68] sm:$0xff]  }
  0xc0   :  { %1469 = vmatprep.mubr.bf16.mxu0 %v7941_v0 }
  0xc1   :  { %5050 = vmatmul.mubr.msk.bf16.gmra.mrb[60].mxu1 %vm305_vm1, %v6366_v31 }
  0xc2   :  { %577 = vmatprep.mubr.bf16.mxu1 %v7941_v0 }
  0xc7   :  { %5191 = vmatmul.mubr.msk.bf16.gmra.mrb[8].mxu0 %vm305_vm1, %v6289_v35  ;;  %v6370_v35 = vld [vmem:[%s7931_s0 + $0x90] sm:$0xff]  }
  0xc8   :  { %1479 = vmatprep.mubr.bf16.mxu0 %v7941_v0 }
  0xc9   :  { %5051 = vmatmul.mubr.msk.bf16.gmra.mrb[64].mxu1 %vm305_vm1, %v6368_v33 }
  0xca   :  { %587 = vmatprep.mubr.bf16.mxu1 %v7941_v0 }
  0xcf   :  { %5192 = vmatmul.mubr.msk.bf16.gmra.mrb[12].mxu0 %vm305_vm1, %v6290_v36  ;;  %v6336_v36 = vld [vmem:[%s7931_s0 + $0x70] sm:$0xff]  }
  0xd0   :  { %1489 = vmatprep.mubr.bf16.mxu0 %v7941_v0 }
  0xd1   :  { %5052 = vmatmul.mubr.msk.bf16.gmra.mrb[68].mxu1 %vm305_vm1, %v6370_v35 }
  0xd2   :  { %597 = vmatprep.mubr.bf16.mxu1 %v7941_v0 }
  0xd7   :  { %5193 = vmatmul.mubr.msk.bf16.gmra.mrb[16].mxu0 %vm305_vm1, %v6291_v37  ;;  %v6372_v37 = vld [vmem:[%s7931_s0 + $0x98] sm:$0xff]  }
  0xd8   :  { %1499 = vmatprep.mubr.bf16.mxu0 %v7941_v0 }
  0xd9   :  { %5053 = vmatmul.mubr.msk.bf16.gmra.mrb[72].mxu1 %vm305_vm1, %v6372_v37 }
  0xda   :  { %607 = vmatprep.mubr.bf16.mxu1 %v7941_v0 }
  0xdf   :  { %5194 = vmatmul.mubr.msk.bf16.gmra.mrb[20].mxu0 %vm305_vm1, %v6292_v38  ;;  %v6338_v38 = vld [vmem:[%s7931_s0 + $0x78] sm:$0xff]  }
  0xe0   :  { %1509 = vmatprep.mubr.bf16.mxu0 %v7941_v0 }
  0xe7   :  { %5195 = vmatmul.mubr.msk.bf16.gmra.mrb[24].mxu0 %vm305_vm1, %v6293_v39  ;;  %v6374_v39 = vld [vmem:[%s7931_s0 + $0xa0] sm:$0xff]  }
  0xe8   :  { %1519 = vmatprep.mubr.bf16.mxu0 %v7941_v0  ;;  %5054 = vmatmul.mubr.msk.bf16.gmra.mrb[76].mxu1 %vm305_vm1, %v6374_v39 }
  0xe9   :  { %617 = vmatprep.mubr.bf16.mxu1 %v7941_v0 }
  0xef   :  { %5196 = vmatmul.mubr.msk.bf16.gmra.mrb[28].mxu0 %vm305_vm1, %v6294_v40  ;;  %v6343_v40 = vld [vmem:[%s7931_s0 + $0x80] sm:$0xff]  }
  0xf0   :  { %1529 = vmatprep.mubr.bf16.mxu0 %v7941_v0 }
  0xf7   :  { %5197 = vmatmul.mubr.msk.bf16.gmra.mrb[32].mxu0 %vm305_vm1, %v6295_v41  ;;  %v6376_v41 = vld [vmem:[%s7931_s0 + $0xa8] sm:$0xff]  }
  0xf8   :  { %1539 = vmatprep.mubr.bf16.mxu0 %v7941_v0  ;;  %5055 = vmatmul.mubr.msk.bf16.gmra.mrb[80].mxu1 %vm305_vm1, %v6376_v41 }
  0xf9   :  { %627 = vmatprep.mubr.bf16.mxu1 %v7941_v0 }
  0xff   :  { %5198 = vmatmul.mubr.msk.bf16.gmra.mrb[36].mxu0 %vm305_vm1, %v6296_v43  ;;  %v6378_v43 = vld [vmem:[%s7931_s0 + $0xb0] sm:$0xff]  }
 0x100   :  { %1549 = vmatprep.mubr.bf16.mxu0 %v7941_v0  ;;  %5056 = vmatmul.mubr.msk.bf16.gmra.mrb[84].mxu1 %vm305_vm1, %v6378_v43 }
 0x101   :  { %637 = vmatprep.mubr.bf16.mxu1 %v7941_v0 }
 0x107   :  { %5199 = vmatmul.mubr.msk.bf16.gmra.mrb[40].mxu0 %vm305_vm1, %v6297_v44  ;;  %v6347_v44 = vld [vmem:[%s7931_s0 + $0x90] sm:$0xff]  }
 0x108   :  { %1559 = vmatprep.mubr.bf16.mxu0 %v7941_v0 }
 0x10f   :  { %5200 = vmatmul.mubr.msk.bf16.gmra.mrb[44].mxu0 %vm305_vm1, %v6298_v45  ;;  %v6380_v45 = vld [vmem:[%s7931_s0 + $0xb8] sm:$0xff]  }
 0x110   :  { %1569 = vmatprep.mubr.bf16.mxu0 %v7941_v0  ;;  %5057 = vmatmul.mubr.msk.bf16.gmra.mrb[88].mxu1 %vm305_vm1, %v6380_v45  ;;  %v6407_v45 = vld [vmem:[#allocation4 + $0x84] ss:$8 sps:$4 sm:$0xff]  }
 0x111   :  { %647 = vmatprep.mubr.bf16.mxu1 %v7941_v0  ;;  %3316 = vmatprep.subr.bf16.mxu1 %v6407_v45  ;;  %v6423_v45 = vld [vmem:[#allocation4 + $0xe0] ss:$8 sps:$4 sm:$0xff]  }
 0x113   :  { %v7213_v3 = vpop.f32.mrb[0].mxu1 }
 0x117   :  { %5201 = vmatmul.mubr.msk.bf16.gmra.mrb[48].mxu0 %vm305_vm1, %v6299_v46  ;;  %v6349_v46 = vld [vmem:[%s7931_s0 + $0x98] sm:$0xff]  }
 0x118   :  { %1579 = vmatprep.mubr.bf16.mxu0 %v7941_v0 }
 0x11f   :  { %5202 = vmatmul.mubr.msk.bf16.gmra.mrb[52].mxu0 %vm305_vm1, %v6303_v47  ;;  %v6382_v47 = vld [vmem:[%s7931_s0 + $0xc0] sm:$0xff]  }
 0x120   :  { %1589 = vmatprep.mubr.bf16.mxu0 %v7941_v0  ;;  %5058 = vmatmul.mubr.msk.bf16.gmra.mrb[92].mxu1 %vm305_vm1, %v6382_v47  ;;  %v6405_v47 = vld [vmem:[#allocation4 + $0x80] ss:$8 sps:$4 sm:$0xff]  }
 0x121   :  { %1076 = vmatprep.mubr.bf16.mxu1 %v7941_v0 }
 0x127   :  { %5203 = vmatmul.mubr.msk.bf16.gmra.mrb[56].mxu0 %vm305_vm1, %v6304_v48  ;;  %v6351_v48 = vld [vmem:[%s7931_s0 + $0xa0] sm:$0xff]  }
 0x128   :  { %1599 = vmatprep.mubr.bf16.mxu0 %v7941_v0 }
 0x12f   :  { %5204 = vmatmul.mubr.msk.bf16.gmra.mrb[60].mxu0 %vm305_vm1, %v6305_v49  ;;  %v6384_v49 = vld [vmem:[%s7931_s0 + $0x88] sm:$0xff]  }
 0x130   :  { %1609 = vmatprep.mubr.bf16.mxu0 %v7941_v0  ;;  %5105 = vmatmul.mubr.msk.bf16.vlgmr.msra.gmra.mrb[68].mxu1 %vm305_vm1, %v6384_v49  ;;  %v6389_v49 = vld [vmem:[%s7931_s0 + $0x80] sm:$0xff]  }
 0x131   :  { %1086 = vmatprep.mubr.bf16.mxu1 %v7941_v0  ;;  %3317 = vmatpush1.bf16.msra.mxu1 %v6405_v47 }
 0x137   :  { %5205 = vmatmul.mubr.msk.bf16.gmra.mrb[64].mxu0 %vm305_vm1, %v6306_v50  ;;  %v6353_v50 = vld [vmem:[%s7931_s0 + $0xa8] sm:$0xff]  }
 0x138   :  { %1619 = vmatprep.mubr.bf16.mxu0 %v7941_v0  ;;  %5106 = vmatmul.mubr.msk.bf16.gmra.mrb[72].mxu1 %vm305_vm1, %v6386_v51  ;;  %v6408_v51 = vld [vmem:[#allocation4 + $0x90] ss:$8 sps:$4 sm:$0xff]  }
 0x139   :  { %1096 = vmatprep.mubr.bf16.mxu1 %v7941_v0 }
 0x13f   :  { %5206 = vmatmul.mubr.msk.bf16.gmra.mrb[68].mxu0 %vm305_vm1, %v6307_v53  ;;  %v6388_v53 = vld [vmem:[%s7931_s0 + $0x98] sm:$0xff]  }
 0x140   :  { %1629 = vmatprep.mubr.bf16.mxu0 %v7941_v0  ;;  %5107 = vmatmul.mubr.msk.bf16.gmra.mrb[76].mxu1 %vm305_vm1, %v6388_v53 }
 0x141   :  { %1106 = vmatprep.mubr.bf16.mxu1 %v7941_v0 }
 0x147   :  { %5207 = vmatmul.mubr.msk.bf16.gmra.mrb[72].mxu0 %vm305_vm1, %v6308_v59  ;;  %v6394_v59 = vld [vmem:[%s7931_s0 + $0xb0] sm:$0xff]  }
 0x148   :  { %1639 = vmatprep.mubr.bf16.mxu0 %v7941_v0  ;;  %5108 = vmatmul.mubr.msk.bf16.gmra.mrb[80].mxu1 %vm305_vm1, %v6390_v55 }
 0x149   :  { %1116 = vmatprep.mubr.bf16.mxu1 %v7941_v0 }
 0x14f   :  { %5208 = vmatmul.mubr.msk.bf16.gmra.mrb[76].mxu0 %vm305_vm1, %v6309_v63  ;;  %v6367_v63 = vld [vmem:[%s7931_s0 + $0x28] sm:$0xff]  }
 0x150   :  { %1649 = vmatprep.mubr.bf16.mxu0 %v7941_v0  ;;  %5109 = vmatmul.mubr.msk.bf16.gmra.mrb[84].mxu1 %vm305_vm1, %v6392_v57 }
 0x151   :  { %1126 = vmatprep.mubr.bf16.mxu1 %v7941_v0 }
 0x157   :  { %5209 = vmatmul.mubr.msk.bf16.gmra.mrb[80].mxu0 %vm305_vm1, %v6310_v2  ;;  %v6371_v2 = vld [vmem:[%s7931_s0 + $0x38] sm:$0xff]  }
 0x158   :  { %1659 = vmatprep.mubr.bf16.mxu0 %v7941_v0  ;;  %5110 = vmatmul.mubr.msk.bf16.gmra.mrb[88].mxu1 %vm305_vm1, %v6394_v59  ;;  %v6416_v59 = vld [vmem:[#allocation4 + $0xb4] ss:$8 sps:$4 sm:$0xff]  }
 0x159   :  { %1136 = vmatprep.mubr.bf16.mxu1 %v7941_v0 }
 0x15f   :  { %5210 = vmatmul.mubr.msk.bf16.gmra.mrb[84].mxu0 %vm305_vm1, %v6311_v4  ;;  %v7216_v4 = vpop.f32.mrb[1].mxu1 }
 0x160   :  { %1669 = vmatprep.mubr.bf16.mxu0 %v7941_v0  ;;  %5111 = vmatmul.mubr.msk.bf16.gmra.mrb[92].mxu1 %vm305_vm1, %v6396_v61  ;;  %v7218_v5 = vpop.f32.mrb[2].mxu1 }
 0x161   :  { %3348 = vmatprep.mubr.bf16.mxu1 %v7941_v0 }
 0x167   :  { %5211 = vmatmul.mubr.msk.bf16.gmra.mrb[88].mxu0 %vm305_vm1, %v6312_v6  ;;  %v7220_v6 = vpop.f32.mrb[3].mxu1 }
 0x168   :  { %1679 = vmatprep.mubr.bf16.mxu0 %v7941_v0 }
 0x16f   :  { %5212 = vmatmul.mubr.msk.bf16.gmra.mrb[92].mxu0 %vm305_vm1, %v6313_v8  ;;  %v7226_v8 = vpop.f32.mrb[4].mxu1 }
 0x170   :  { %2088 = vmatprep.mubr.bf16.mxu0 %v7941_v0  ;;  %v7229_v9 = vpop.f32.mrb[5].mxu1 }
 0x177   :  { %5290 = vmatmul.mubr.msk.bf16.vlgmr.msra.gmra.mrb[0].mxu0 %vm305_vm1, %v6314_v10  ;;  %v7231_v10 = vpop.f32.mrb[6].mxu1 }
 0x178   :  { %2696 = vmatpush1.bf16.msra.mxu0 %v6315_v11  ;;  %2098 = vmatprep.mubr.bf16.mxu0 %v7941_v0  ;;  %v7233_v11 = vpop.f32.mrb[7].mxu1 }
 0x179   :  { %5390 = vmatprep.subr.msk.bf16.mxu0 %vm378_vm0, %v6339_v12  ;;  %v6375_v12 = vld [vmem:[%s7931_s0 + $0x48] sm:$0xff]   ;;  %v7239_v13 = vpop.f32.mrb[8].mxu1 }
 0x17a   :  { %v7242_v14 = vpop.f32.mrb[9].mxu1 }
 0x17c   :  { %2698 = vmatpush1.bf16.msra.mxu0 %v2690_v15  ;;  %v7244_v15 = vpop.f32.mrb[10].mxu1 }
 0x17f   :  { %5291 = vmatmul.mubr.msk.bf16.gmra.mrb[4].mxu0 %vm305_vm1, %v6318_v16  ;;  %v7246_v16 = vpop.f32.mrb[11].mxu1 }
 0x180   :  { %2108 = vmatprep.mubr.bf16.mxu0 %v7941_v0 }
 0x187   :  { %5292 = vmatmul.mubr.msk.bf16.gmra.mrb[8].mxu0 %vm305_vm1, %v6319_v18  ;;  %v7252_v18 = vpop.f32.mrb[12].mxu1 }
 0x188   :  { %2118 = vmatprep.mubr.bf16.mxu0 %v7941_v0  ;;  %v7255_v19 = vpop.f32.mrb[13].mxu1 }
 0x18f   :  { %5293 = vmatmul.mubr.msk.bf16.gmra.mrb[12].mxu0 %vm305_vm1, %v6320_v20  ;;  %v7257_v20 = vpop.f32.mrb[14].mxu1 }
 0x190   :  { %2128 = vmatprep.mubr.bf16.mxu0 %v7941_v0  ;;  %v7259_v21 = vpop.f32.mrb[15].mxu1 }
 0x191   :  { %v7265_v23 = vpop.f32.mrb[16].mxu1 }
 0x197   :  { %5294 = vmatmul.mubr.msk.bf16.gmra.mrb[16].mxu0 %vm305_vm1, %v6321_v22  ;;  %v6379_v22 = vld [vmem:[%s7931_s0 + $0x58] sm:$0xff]  }
 0x198   :  { %2138 = vmatprep.mubr.bf16.mxu0 %v7941_v0 }
 0x19f   :  { %5295 = vmatmul.mubr.msk.bf16.gmra.mrb[20].mxu0 %vm305_vm1, %v6322_v24  ;;  %v7268_v24 = vpop.f32.mrb[17].mxu1 }
 0x1a0   :  { %2148 = vmatprep.mubr.bf16.mxu0 %v7941_v0  ;;  %v7270_v25 = vpop.f32.mrb[18].mxu1 }
 0x1a7   :  { %5296 = vmatmul.mubr.msk.bf16.gmra.mrb[24].mxu0 %vm305_vm1, %v6323_v26  ;;  %v7272_v26 = vpop.f32.mrb[19].mxu1 }
 0x1a8   :  { %2158 = vmatprep.mubr.bf16.mxu0 %v7941_v0 }
 0x1af   :  { %5297 = vmatmul.mubr.msk.bf16.gmra.mrb[28].mxu0 %vm305_vm1, %v6324_v28  ;;  %v7277_v28 = vpop.f32.mrb[20].mxu1 }
 0x1b0   :  { %2168 = vmatprep.mubr.bf16.mxu0 %v7941_v0  ;;  %v7279_v29 = vpop.f32.mrb[21].mxu1 }
 0x1b7   :  { %5298 = vmatmul.mubr.msk.bf16.gmra.mrb[32].mxu0 %vm305_vm1, %v6325_v30  ;;  %v7281_v30 = vpop.f32.mrb[22].mxu1 }
 0x1b8   :  { %2178 = vmatprep.mubr.bf16.mxu0 %v7941_v0  ;;  %v7283_v31 = vpop.f32.mrb[23].mxu1 }
 0x1bf   :  { %5299 = vmatmul.mubr.msk.bf16.gmra.mrb[36].mxu0 %vm305_vm1, %v6329_v32  ;;  %v7286_v32 = vpop.f32.mrb[24].mxu1 }
 0x1c0   :  { %2188 = vmatprep.mubr.bf16.mxu0 %v7941_v0  ;;  %v7289_v33 = vpop.f32.mrb[25].mxu1 }
 0x1c7   :  { %5300 = vmatmul.mubr.msk.bf16.gmra.mrb[40].mxu0 %vm305_vm1, %v6334_v34  ;;  %v7291_v34 = vpop.f32.mrb[26].mxu1 }
 0x1c8   :  { %2198 = vmatprep.mubr.bf16.mxu0 %v7941_v0  ;;  %v7293_v35 = vpop.f32.mrb[27].mxu1 }
 0x1c9   :  { %v7298_v37 = vpop.f32.mrb[28].mxu1 }
 0x1cf   :  { %5301 = vmatmul.mubr.msk.bf16.gmra.mrb[44].mxu0 %vm305_vm1, %v6336_v36  ;;  %v6383_v36 = vld [vmem:[%s7931_s0 + $0x68] sm:$0xff]  }
 0x1d0   :  { %2208 = vmatprep.mubr.bf16.mxu0 %v7941_v0 }
 0x1d7   :  { %5302 = vmatmul.mubr.msk.bf16.gmra.mrb[48].mxu0 %vm305_vm1, %v6338_v38  ;;  %v7300_v38 = vpop.f32.mrb[29].mxu1 }
 0x1d8   :  { %2218 = vmatprep.mubr.bf16.mxu0 %v7941_v0  ;;  %v7302_v39 = vpop.f32.mrb[30].mxu1 }
 0x1d9   :  { %v7311_v41 = vpop.f32.mrb[31].mxu1 }
 0x1da   :  { %v7317_v43 = vpop.f32.mrb[32].mxu1 }
 0x1df   :  { %5303 = vmatmul.mubr.msk.bf16.gmra.mrb[52].mxu0 %vm305_vm1, %v6343_v40  ;;  %v6385_v40 = vld [vmem:[%s7931_s0 + $0x70] sm:$0xff]  }
 0x1e0   :  { %2228 = vmatprep.mubr.bf16.mxu0 %v7941_v0 }
 0x1e7   :  { %5304 = vmatmul.mubr.msk.bf16.gmra.mrb[56].mxu0 %vm305_vm1, %v6345_v42  ;;  %v6387_v42 = vld [vmem:[%s7931_s0 + $0x78] sm:$0xff]  }
 0x1e8   :  { %2238 = vmatprep.mubr.bf16.mxu0 %v7941_v0 }
 0x1ef   :  { %5305 = vmatmul.mubr.msk.bf16.gmra.mrb[60].mxu0 %vm305_vm1, %v6347_v44  ;;  %v7320_v44 = vpop.f32.mrb[33].mxu1 }
 0x1f0   :  { %2248 = vmatprep.mubr.bf16.mxu0 %v7941_v0 }
 0x1f7   :  { %5306 = vmatmul.mubr.msk.bf16.gmra.mrb[64].mxu0 %vm305_vm1, %v6349_v46  ;;  %v7322_v46 = vpop.f32.mrb[34].mxu1 }
 0x1f8   :  { %2258 = vmatprep.mubr.bf16.mxu0 %v7941_v0 }
 0x1ff   :  { %5307 = vmatmul.mubr.msk.bf16.gmra.mrb[68].mxu0 %vm305_vm1, %v6351_v48  ;;  %v7324_v48 = vpop.f32.mrb[35].mxu1 }
 0x200   :  { %2268 = vmatprep.mubr.bf16.mxu0 %v7941_v0 }
 0x207   :  { %5308 = vmatmul.mubr.msk.bf16.gmra.mrb[72].mxu0 %vm305_vm1, %v6353_v50  ;;  %v6410_v50 = vld [vmem:[#allocation4 + $0x94] ss:$8 sps:$4 sm:$0xff]  }
 0x208   :  { %2278 = vmatprep.mubr.bf16.mxu0 %v7941_v0  ;;  %3318 = vmatprep.subr.bf16.mxu1 %v6410_v50  ;;  %v6428_v50 = vld [vmem:[#allocation4 + $0xf4] ss:$8 sps:$4 sm:$0xff]  }
 0x209   :  { %3319 = vmatpush1.bf16.msra.mxu1 %v6408_v51  ;;  %v6426_v51 = vld [vmem:[#allocation4 + $0xf0] ss:$8 sps:$4 sm:$0xff]  }
 0x20f   :  { %5309 = vmatmul.mubr.msk.bf16.gmra.mrb[76].mxu0 %vm305_vm1, %v6355_v52  ;;  %v7330_v52 = vpop.f32.mrb[36].mxu1 }
 0x210   :  { %2288 = vmatprep.mubr.bf16.mxu0 %v7941_v0  ;;  %v7333_v53 = vpop.f32.mrb[37].mxu1 }
 0x211   :  { %v7335_v55 = vpop.f32.mrb[38].mxu1 }
 0x212   :  { %v7337_v57 = vpop.f32.mrb[39].mxu1 }
 0x213   :  { %v7343_v61 = vpop.f32.mrb[40].mxu1 }
 0x217   :  { %5310 = vmatmul.mubr.msk.bf16.gmra.mrb[80].mxu0 %vm305_vm1, %v6357_v54  ;;  %v6413_v54 = vld [vmem:[#allocation4 + $0xa4] ss:$8 sps:$4 sm:$0xff]  }
 0x218   :  { %2298 = vmatprep.mubr.bf16.mxu0 %v7941_v0  ;;  %3320 = vmatprep.subr.bf16.mxu1 %v6413_v54 }
 0x21f   :  { %5311 = vmatmul.mubr.msk.bf16.gmra.mrb[84].mxu0 %vm305_vm1, %v6359_v56  ;;  %v6411_v56 = vld [vmem:[#allocation4 + $0xa0] ss:$8 sps:$4 sm:$0xff]  }
 0x220   :  { %2308 = vmatprep.mubr.bf16.mxu0 %v7941_v0  ;;  %3321 = vmatpush1.bf16.msra.mxu1 %v6411_v56 }
 0x221   :  { %3322 = vmatprep.subr.bf16.mxu1 %v6416_v59 }
 0x227   :  { %5312 = vmatmul.mubr.msk.bf16.gmra.mrb[88].mxu0 %vm305_vm1, %v6361_v58  ;;  %v6391_v58 = vld [vmem:[%s7931_s0 + $0x88] sm:$0xff]  }
 0x228   :  { %2318 = vmatprep.mubr.bf16.mxu0 %v7941_v0 }
 0x22f   :  { %5313 = vmatmul.mubr.msk.bf16.gmra.mrb[92].mxu0 %vm305_vm1, %v6363_v60  ;;  %v6414_v60 = vld [vmem:[#allocation4 + $0xb0] ss:$8 sps:$4 sm:$0xff]  }
 0x230   :  { %2727 = vmatprep.mubr.bf16.mxu0 %v7941_v0  ;;  %3323 = vmatpush1.bf16.msra.mxu1 %v6414_v60  ;;  %v6397_v60 = vld [vmem:[%s7931_s0 + $0xa0] sm:$0xff]  }
 0x237   :  { %5391 = vmatmul.mubr.msk.bf16.vlgmr.msra.gmra.mrb[0].mxu0 %vm305_vm1, %v6365_v62  ;;  %v7346_v62 = vpop.f32.mrb[41].mxu1 }
 0x238   :  { %2737 = vmatprep.mubr.bf16.mxu0 %v7941_v0 }
 0x23f   :  { %5392 = vmatmul.mubr.msk.bf16.gmra.mrb[4].mxu0 %vm305_vm1, %v6367_v63  ;;  %v6419_v63 = vld [vmem:[#allocation4 + $0xc4] ss:$8 sps:$4 sm:$0xff]  }
 0x240   :  { %2747 = vmatprep.mubr.bf16.mxu0 %v7941_v0  ;;  %3324 = vmatprep.subr.bf16.mxu1 %v6419_v63 }
 0x247   :  { %5393 = vmatmul.mubr.msk.bf16.gmra.mrb[8].mxu0 %vm305_vm1, %v6369_v1  ;;  %v7348_v1 = vpop.f32.mrb[42].mxu1 }
 0x248   :  { %2757 = vmatprep.mubr.bf16.mxu0 %v7941_v0 }
 0x24f   :  { %5394 = vmatmul.mubr.msk.bf16.gmra.mrb[12].mxu0 %vm305_vm1, %v6371_v2  ;;  %v6417_v2 = vld [vmem:[#allocation4 + $0xc0] ss:$8 sps:$4 sm:$0xff]  }
 0x250   :  { %2767 = vmatprep.mubr.bf16.mxu0 %v7941_v0  ;;  %3325 = vmatpush1.bf16.msra.mxu1 %v6417_v2 }
 0x257   :  { %5395 = vmatmul.mubr.msk.bf16.gmra.mrb[16].mxu0 %vm305_vm1, %v6373_v7  ;;  %v7350_v7 = vpop.f32.mrb[43].mxu1 }
 0x258   :  { %2777 = vmatprep.mubr.bf16.mxu0 %v7941_v0 }
 0x25f   :  { %5396 = vmatmul.mubr.msk.bf16.gmra.mrb[20].mxu0 %vm305_vm1, %v6375_v12  ;;  %v6393_v12 = vld [vmem:[%s7931_s0 + $0x90] sm:$0xff]  }
 0x260   :  { %2787 = vmatprep.mubr.bf16.mxu0 %v7941_v0 }
 0x267   :  { %5397 = vmatmul.mubr.msk.bf16.gmra.mrb[24].mxu0 %vm305_vm1, %v6377_v17  ;;  %v6422_v17 = vld [vmem:[#allocation4 + $0xd4] ss:$8 sps:$4 sm:$0xff]  }
 0x268   :  { %2797 = vmatprep.mubr.bf16.mxu0 %v7941_v0  ;;  %3326 = vmatprep.subr.bf16.mxu1 %v6422_v17 }
 0x26f   :  { %5398 = vmatmul.mubr.msk.bf16.gmra.mrb[28].mxu0 %vm305_vm1, %v6379_v22  ;;  %v6420_v22 = vld [vmem:[#allocation4 + $0xd0] ss:$8 sps:$4 sm:$0xff]  }
 0x270   :  { %2807 = vmatprep.mubr.bf16.mxu0 %v7941_v0  ;;  %3327 = vmatpush1.bf16.msra.mxu1 %v6420_v22  ;;  %v6398_v22 = vld [vmem:[%s7931_s0 + $0xa8] sm:$0xff]  }
 0x277   :  { %5399 = vmatmul.mubr.msk.bf16.gmra.mrb[32].mxu0 %vm305_vm1, %v6381_v27  ;;  %v7356_v27 = vpop.f32.mrb[44].mxu1 }
 0x278   :  { %2817 = vmatprep.mubr.bf16.mxu0 %v7941_v0 }
 0x27f   :  { %5400 = vmatmul.mubr.msk.bf16.gmra.mrb[36].mxu0 %vm305_vm1, %v6383_v36  ;;  %v7359_v36 = vpop.f32.mrb[45].mxu1 }
 0x280   :  { %2827 = vmatprep.mubr.bf16.mxu0 %v7941_v0 }
 0x287   :  { %5401 = vmatmul.mubr.msk.bf16.gmra.mrb[40].mxu0 %vm305_vm1, %v6385_v40  ;;  %v6425_v40 = vld [vmem:[#allocation4 + $0xe4] ss:$8 sps:$4 sm:$0xff]  }
 0x288   :  { %2837 = vmatprep.mubr.bf16.mxu0 %v7941_v0  ;;  %3328 = vmatprep.subr.bf16.mxu1 %v6425_v40 }
 0x289   :  { %3329 = vmatpush1.bf16.msra.mxu1 %v6423_v45 }
 0x28a   :  { %3330 = vmatprep.subr.bf16.mxu1 %v6428_v50 }
 0x28d   :  { %3331 = vmatpush1.bf16.msra.mxu1 %v6426_v51  ;;  %v6399_v51 = vld [vmem:[%s7931_s0 + $0xb0] sm:$0xff]  }
 0x28f   :  { %5402 = vmatmul.mubr.msk.bf16.gmra.mrb[44].mxu0 %vm305_vm1, %v6387_v42  ;;  %v7361_v42 = vpop.f32.mrb[46].mxu1 }
 0x290   :  { %2847 = vmatprep.mubr.bf16.mxu0 %v7941_v0  ;;  %v7363_v47 = vpop.f32.mrb[47].mxu1 }
 0x291   :  { %v7369_v54 = vpop.f32.mrb[48].mxu1 }
 0x292   :  { %7943 = vst [vmem:[#allocation8_spill] sm:$0xff] %v7369_v54  ;;  %v7372_v56 = vpop.f32.mrb[49].mxu1 }
 0x293   :  { %7944 = vst [vmem:[#allocation9_spill] sm:$0xff] %v7372_v56 }
 0x297   :  { %5403 = vmatmul.mubr.msk.bf16.gmra.mrb[48].mxu0 %vm305_vm1, %v6389_v49  ;;  %v6395_v49 = vld [vmem:[%s7931_s0 + $0x98] sm:$0xff]  }
 0x298   :  { %2857 = vmatprep.mubr.bf16.mxu0 %v7941_v0 }
 0x29f   :  { %5404 = vmatmul.mubr.msk.bf16.gmra.mrb[52].mxu0 %vm305_vm1, %v6391_v58  ;;  %v7374_v58 = vpop.f32.mrb[50].mxu1 }
 0x2a0   :  { %2867 = vmatprep.mubr.bf16.mxu0 %v7941_v0  ;;  %7945 = vst [vmem:[#allocation10_spill] sm:$0xff] %v7374_v58  ;;  %v7376_v59 = vpop.f32.mrb[51].mxu1 }
 0x2a1   :  { %7946 = vst [vmem:[#allocation11_spill] sm:$0xff] %v7376_v59  ;;  %v7382_v63 = vpop.f32.mrb[52].mxu1 }
 0x2a2   :  { %7947 = vst [vmem:[#allocation12_spill] sm:$0xff] %v7382_v63  ;;  %v7385_v2 = vpop.f32.mrb[53].mxu1 }
 0x2a3   :  { %7948 = vst [vmem:[#allocation13_spill] sm:$0xff] %v7385_v2 }
 0x2a7   :  { %5405 = vmatmul.mubr.msk.bf16.gmra.mrb[56].mxu0 %vm305_vm1, %v6393_v12  ;;  %v7387_v12 = vpop.f32.mrb[54].mxu1 }
 0x2a8   :  { %2877 = vmatprep.mubr.bf16.mxu0 %v7941_v0  ;;  %7949 = vst [vmem:[#allocation14_spill] sm:$0xff] %v7387_v12  ;;  %v7389_v17 = vpop.f32.mrb[55].mxu1 }
 0x2a9   :  { %7950 = vst [vmem:[#allocation15_spill] sm:$0xff] %v7389_v17  ;;  %v7395_v40 = vpop.f32.mrb[56].mxu1 }
 0x2aa   :  { %7951 = vst [vmem:[#allocation16_spill] sm:$0xff] %v7395_v40  ;;  %v7398_v45 = vpop.f32.mrb[57].mxu1 }
 0x2ab   :  { %7952 = vst [vmem:[#allocation17_spill] sm:$0xff] %v7398_v45 }
 0x2af   :  { %5406 = vmatmul.mubr.msk.bf16.gmra.mrb[60].mxu0 %vm305_vm1, %v6395_v49  ;;  %v7400_v49 = vpop.f32.mrb[58].mxu1 }
 0x2b0   :  { %2887 = vmatprep.mubr.bf16.mxu0 %v7941_v0  ;;  %7953 = vst [vmem:[#allocation18_spill] sm:$0xff] %v7400_v49  ;;  %v7402_v50 = vpop.f32.mrb[59].mxu1 }
 0x2b1   :  { %7954 = vst [vmem:[#allocation19_spill] sm:$0xff] %v7402_v50  ;;  %v6400_v50 = vld [vmem:[%s7931_s0 + $0xb8] sm:$0xff]  }
 0x2b7   :  { %5407 = vmatmul.mubr.msk.bf16.gmra.mrb[64].mxu0 %vm305_vm1, %v6397_v60  ;;  %v7408_v60 = vpop.f32.mrb[60].mxu1 }
 0x2b8   :  { %2897 = vmatprep.mubr.bf16.mxu0 %v7941_v0  ;;  %7955 = vst [vmem:[#allocation20_spill] sm:$0xff] %v7408_v60 }
 0x2bf   :  { %5408 = vmatmul.mubr.msk.bf16.gmra.mrb[68].mxu0 %vm305_vm1, %v6398_v22  ;;  %v7411_v22 = vpop.f32.mrb[61].mxu1 }
 0x2c0   :  { %2907 = vmatprep.mubr.bf16.mxu0 %v7941_v0  ;;  %7956 = vst [vmem:[#allocation21_spill] sm:$0xff] %v7411_v22  ;;  %v7413_v40 = vpop.f32.mrb[62].mxu1 }
 0x2c1   :  { %7957 = vst [vmem:[#allocation22_spill] sm:$0xff] %v7413_v40  ;;  %v7415_v17 = vpop.f32.mrb[63].mxu1 }
 0x2c2   :  { %7958 = vst [vmem:[#allocation23_spill] sm:$0xff] %v7415_v17  ;;  %v7421_v49 = vpop.f32.mrb[64].mxu1  ;;  %v6401_v17 = vld [vmem:[%s7931_s0 + $0xc0] sm:$0xff]  }
 0x2c3   :  { %7959 = vst [vmem:[#allocation24_spill] sm:$0xff] %v7421_v49 }
 0x2c7   :  { %5409 = vmatmul.mubr.msk.bf16.gmra.mrb[72].mxu0 %vm305_vm1, %v6399_v51  ;;  %v7424_v51 = vpop.f32.mrb[65].mxu1 }
 0x2c8   :  { %2917 = vmatprep.mubr.bf16.mxu0 %v7941_v0  ;;  %7960 = vst [vmem:[#allocation25_spill] sm:$0xff] %v7424_v51  ;;  %v7426_v60 = vpop.f32.mrb[66].mxu1 }
 0x2c9   :  { %7961 = vst [vmem:[#allocation26_spill] sm:$0xff] %v7426_v60  ;;  %v7428_v45 = vpop.f32.mrb[67].mxu1 }
 0x2ca   :  { %7962 = vst [vmem:[#allocation27_spill] sm:$0xff] %v7428_v45  ;;  %v7434_v40 = vpop.f32.mrb[68].mxu1  ;;  %v6402_v45 = vld [vmem:[%s7931_s0 + $0xc8] sm:$0xff]  }
 0x2cb   :  { %7963 = vst [vmem:[#allocation28_spill] sm:$0xff] %v7434_v40 }
 0x2cf   :  { %5410 = vmatmul.mubr.msk.bf16.gmra.mrb[76].mxu0 %vm305_vm1, %v6400_v50  ;;  %v7437_v50 = vpop.f32.mrb[69].mxu1 }
 0x2d0   :  { %2927 = vmatprep.mubr.bf16.mxu0 %v7941_v0  ;;  %7964 = vst [vmem:[#allocation29_spill] sm:$0xff] %v7437_v50  ;;  %v7439_v49 = vpop.f32.mrb[70].mxu1 }
 0x2d1   :  { %7965 = vst [vmem:[#allocation30_spill] sm:$0xff] %v7439_v49  ;;  %v7441_v22 = vpop.f32.mrb[71].mxu1 }
 0x2d2   :  { %7966 = vst [vmem:[#allocation31_spill] sm:$0xff] %v7441_v22  ;;  %v7447_v60 = vpop.f32.mrb[72].mxu1  ;;  %v6403_v22 = vld [vmem:[%s7931_s0 + $0xd0] sm:$0xff]  }
 0x2d3   :  { %7967 = vst [vmem:[#allocation32_spill] sm:$0xff] %v7447_v60 }
 0x2d7   :  { %5411 = vmatmul.mubr.msk.bf16.gmra.mrb[80].mxu0 %vm305_vm1, %v6401_v17  ;;  %v7450_v17 = vpop.f32.mrb[73].mxu1 }
 0x2d8   :  { %2937 = vmatprep.mubr.bf16.mxu0 %v7941_v0  ;;  %7968 = vst [vmem:[#allocation33_spill] sm:$0xff] %v7450_v17  ;;  %v7452_v40 = vpop.f32.mrb[74].mxu1  ;;  %v6431_v17 = vld [vmem:[#allocation4 + $0x4] ss:$8 sps:$4 sm:$0xff]  }
 0x2d9   :  { %7969 = vst [vmem:[#allocation34_spill] sm:$0xff] %v7452_v40  ;;  %v7454_v51 = vpop.f32.mrb[75].mxu1  ;;  %3509 = vmatprep.subr.bf16.mxu1 %v6431_v17 }
 0x2da   :  { %7970 = vst [vmem:[#allocation35_spill] sm:$0xff] %v7454_v51  ;;  %v7460_v49 = vpop.f32.mrb[76].mxu1  ;;  %v6404_v51 = vld [vmem:[%s7931_s0 + $0xd8] sm:$0xff]  }
 0x2db   :  { %7971 = vst [vmem:[#allocation36_spill] sm:$0xff] %v7460_v49 }
 0x2df   :  { %5412 = vmatmul.mubr.msk.bf16.gmra.mrb[84].mxu0 %vm305_vm1, %v6402_v45  ;;  %v7463_v45 = vpop.f32.mrb[77].mxu1 }
 0x2e0   :  { %2947 = vmatprep.mubr.bf16.mxu0 %v7941_v0  ;;  %7972 = vst [vmem:[#allocation37_spill] sm:$0xff] %v7463_v45  ;;  %v7465_v60 = vpop.f32.mrb[78].mxu1 }
 0x2e1   :  { %7973 = vst [vmem:[#allocation38_spill] sm:$0xff] %v7465_v60  ;;  %v7467_v50 = vpop.f32.mrb[79].mxu1 }
 0x2e2   :  { %7974 = vst [vmem:[#allocation39_spill] sm:$0xff] %v7467_v50  ;;  %v7473_v40 = vpop.f32.mrb[80].mxu1 }
 0x2e3   :  { %7975 = vst [vmem:[#allocation40_spill] sm:$0xff] %v7473_v40 }
 0x2e7   :  { %5413 = vmatmul.mubr.msk.bf16.gmra.mrb[88].mxu0 %vm305_vm1, %v6403_v22  ;;  %v7475_v22 = vpop.f32.mrb[81].mxu1 }
 0x2e8   :  { %2957 = vmatprep.mubr.bf16.mxu0 %v7941_v0  ;;  %7976 = vst [vmem:[#allocation41_spill] sm:$0xff] %v7475_v22  ;;  %v7477_v49 = vpop.f32.mrb[82].mxu1 }
 0x2e9   :  { %7977 = vst [vmem:[#allocation42_spill] sm:$0xff] %v7477_v49  ;;  %v7479_v0 = vpop.f32.mrb[83].mxu1 }
 0x2ea   :  { %7978 = vst [vmem:[#allocation43_spill] sm:$0xff] %v7479_v0  ;;  %v7481_v45 = vpop.f32.mrb[84].mxu1 }
 0x2eb   :  { %7979 = vst [vmem:[#allocation44_spill] sm:$0xff] %v7481_v45  ;;  %v7483_v60 = vpop.f32.mrb[85].mxu1 }
 0x2ec   :  { %7980 = vst [vmem:[#allocation45_spill] sm:$0xff] %v7483_v60  ;;  %v7485_v50 = vpop.f32.mrb[86].mxu1 }
 0x2ed   :  { %7981 = vst [vmem:[#allocation46_spill] sm:$0xff] %v7485_v50  ;;  %v7487_v12 = vpop.f32.mrb[87].mxu1 }
 0x2ee   :  { %7982 = vst [vmem:[#allocation47_spill] sm:$0xff] %v7487_v12  ;;  %v7489_v2 = vpop.f32.mrb[88].mxu1 }
 0x2ef   :  { %5414 = vmatmul.mubr.msk.bf16.gmra.mrb[92].mxu0 %vm305_vm1, %v6404_v51  ;;  %7983 = vst [vmem:[#allocation48_spill] sm:$0xff] %v7489_v2  ;;  %v7491_v51 = vpop.f32.mrb[89].mxu1 }
 0x2f0   :  { %7984 = vst [vmem:[#allocation49_spill] sm:$0xff] %v7491_v51  ;;  %v7493_v40 = vpop.f32.mrb[90].mxu1 }
 0x2f1   :  { %7985 = vst [vmem:[#allocation50_spill] sm:$0xff] %v7493_v40  ;;  %v7495_v22 = vpop.f32.mrb[91].mxu1 }
 0x2f2   :  { %7986 = vst [vmem:[#allocation51_spill] sm:$0xff] %v7495_v22  ;;  %v7497_v49 = vpop.f32.mrb[92].mxu1 }
 0x2f3   :  { %7987 = vst [vmem:[#allocation52_spill] sm:$0xff] %v7497_v49  ;;  %v7499_v17 = vpop.f32.mrb[93].mxu1 }
 0x2f4   :  { %7988 = vst [vmem:[#allocation53_spill] sm:$0xff] %v7499_v17  ;;  %v7501_v0 = vpop.f32.mrb[94].mxu1 }
 0x2f5   :  { %7989 = vst [vmem:[#allocation54_spill] sm:$0xff] %v7501_v0  ;;  %v7503_v60 = vpop.f32.mrb[95].mxu1 }
 0x2f6   :  { %7990 = vst [vmem:[#allocation55_spill] sm:$0xff] %v7503_v60 }
 0x30a   :  { %v2729_v45 = vpop.f32.mrb[0].mxu0 }
 0x30b   :  { %v5736_v50 = vadd.f32 %v2729_v45, %v7213_v3  ;;  %v2731_v12 = vpop.f32.mrb[1].mxu0 }
 0x30c   :  { %v5737_v2 = vadd.f32 %v2731_v12, %v7216_v4  ;;  %v2733_v63 = vpop.f32.mrb[2].mxu0 }
 0x30d   :  { %v5738_v51 = vadd.f32 %v2733_v63, %v7218_v5  ;;  %v2735_v40 = vpop.f32.mrb[3].mxu0  ;;  %v7516_v5 = vld [vmem:[%s7933_s2] ss:$0 sm:$0xff] }
 0x30e   :  { %v3064_v59 = vmax.f32 %v5736_v50, %v5737_v2  ;;  %v5739_v22 = vadd.f32 %v2735_v40, %v7220_v6 }
 0x310   :  { %v3065_v49 = vmax.f32 %v5738_v51, %v5739_v22 }
 0x312   :  { %v2739_v58 = vpop.f32.mrb[4].mxu0 }
 0x313   :  { %v5740_v17 = vadd.f32 %v2739_v58, %v7226_v8  ;;  %v2741_v0 = vpop.f32.mrb[5].mxu0 }
 0x314   :  { %v5741_v56 = vadd.f32 %v2741_v0, %v7229_v9  ;;  %v2743_v60 = vpop.f32.mrb[6].mxu0 }
 0x315   :  { %v5742_v3 = vadd.f32 %v2743_v60, %v7231_v10  ;;  %v2745_v45 = vpop.f32.mrb[7].mxu0 }
 0x316   :  { %v3066_v54 = vmax.f32 %v5740_v17, %v5741_v56  ;;  %v5743_v4 = vadd.f32 %v2745_v45, %v7233_v11 }
 0x318   :  { %v3112_v6 = vmax.f32 %v3064_v59, %v3066_v54  ;;  %v3067_v63 = vmax.f32 %v5742_v3, %v5743_v4 }
 0x31a   :  { %v3143_v2 = vadd.f32 %v7516_v5, %v3112_v6  ;;  %v3113_v8 = vmax.f32 %v3065_v49, %v3067_v63  ;;  %v2749_v58 = vpop.f32.mrb[8].mxu0 }
 0x31b   :  { %v5744_v0 = vadd.f32 %v2749_v58, %v7239_v13  ;;  %v2751_v9 = vpop.f32.mrb[9].mxu0 }
 0x31c   :  { %v3144_v10 = vadd.f32 %v7516_v5, %v3113_v8  ;;  %v5745_v56 = vadd.f32 %v2751_v9, %v7242_v14  ;;  %v2753_v12 = vpop.f32.mrb[10].mxu0  ;;  %v3167_v60 = vmax.f32 %v3143_v2, 0.0 }
 0x31d   :  { %v5746_v11 = vadd.f32 %v2753_v12, %v7244_v15  ;;  %v2755_v40 = vpop.f32.mrb[11].mxu0 }
 0x31e   :  { %v3168_v50 = vmax.f32 %v3144_v10, 0.0  ;;  %v3068_v22 = vmax.f32 %v5744_v0, %v5745_v56  ;;  %v5747_v54 = vadd.f32 %v2755_v40, %v7246_v16 }
 0x320   :  { %v7524_v59 = vpack.c.bf16 %v3168_v50, %v3167_v60  ;;  %v3069_v49 = vmax.f32 %v5746_v11, %v5747_v54  ;;  %v6429_v60 = vld [vmem:[#allocation4] ss:$8 sps:$4 sm:$0xff]   ;;  %v6434_v54 = vld [vmem:[#allocation4 + $0x14] ss:$8 sps:$4 sm:$0xff]  }
 0x322   :  { %v2759_v51 = vpop.f32.mrb[12].mxu0 }
 0x323   :  { %v5748_v13 = vadd.f32 %v2759_v51, %v7252_v18  ;;  %v2761_v17 = vpop.f32.mrb[13].mxu0  ;;  %v7991_v51 = vmov 0  }
 0x324   :  { %v5749_v3 = vadd.f32 %v2761_v17, %v7255_v19  ;;  %v2763_v45 = vpop.f32.mrb[14].mxu0 }
 0x325   :  { %v5750_v14 = vadd.f32 %v2763_v45, %v7257_v20  ;;  %v2765_v4 = vpop.f32.mrb[15].mxu0 }
 0x326   :  { %v3070_v15 = vmax.f32 %v5748_v13, %v5749_v3  ;;  %v5751_v6 = vadd.f32 %v2765_v4, %v7259_v21 }
 0x328   :  { %v3114_v63 = vmax.f32 %v3068_v22, %v3070_v15  ;;  %v3071_v2 = vmax.f32 %v5750_v14, %v5751_v6  ;;  %v6435_v15 = vld [vmem:[#allocation4 + $0x20] ss:$8 sps:$4 sm:$0xff]  }
 0x32a   :  { %v3145_v16 = vadd.f32 %v7516_v5, %v3114_v63  ;;  %v3115_v8 = vmax.f32 %v3069_v49, %v3071_v2  ;;  %v2769_v58 = vpop.f32.mrb[16].mxu0  ;;  %v6440_v63 = vld [vmem:[#allocation4 + $0x34] ss:$8 sps:$4 sm:$0xff]  }
 0x32b   :  { %v5752_v0 = vadd.f32 %v2769_v58, %v7265_v23  ;;  %v2771_v9 = vpop.f32.mrb[17].mxu0 }
 0x32c   :  { %v3146_v18 = vadd.f32 %v7516_v5, %v3115_v8  ;;  %v5753_v19 = vadd.f32 %v2771_v9, %v7268_v24  ;;  %v2773_v10 = vpop.f32.mrb[18].mxu0  ;;  %v3169_v12 = vmax.f32 %v3145_v16, 0.0 }
 0x32d   :  { %v5754_v20 = vadd.f32 %v2773_v10, %v7270_v25  ;;  %v2775_v56 = vpop.f32.mrb[19].mxu0  ;;  %v6432_v25 = vld [vmem:[#allocation4 + $0x10] ss:$8 sps:$4 sm:$0xff]  }
 0x32e   :  { %v3170_v11 = vmax.f32 %v3146_v18, 0.0  ;;  %v3072_v21 = vmax.f32 %v5752_v0, %v5753_v19  ;;  %v5755_v40 = vadd.f32 %v2775_v56, %v7272_v26  ;;  %v6437_v26 = vld [vmem:[#allocation4 + $0x24] ss:$8 sps:$4 sm:$0xff]   ;;  %v6438_v0 = vld [vmem:[#allocation4 + $0x30] ss:$8 sps:$4 sm:$0xff]  }
 0x32f   :  { %v6443_v18 = vld [vmem:[#allocation4 + $0x44] ss:$8 sps:$4 sm:$0xff]  }
 0x330   :  { %v7536_v50 = vpack.c.bf16 %v3170_v11, %v3169_v12  ;;  %v3073_v22 = vmax.f32 %v5754_v20, %v5755_v40 }
 0x332   :  { %v2779_v23 = vpop.f32.mrb[20].mxu0  ;;  %3349 = vmatmul.mubr.bf16.vlgmr.msra.gmra.mrb[96].mxu1 %v7536_v50 }
 0x333   :  { %v5756_v49 = vadd.f32 %v2779_v23, %v7277_v28  ;;  %v2781_v24 = vpop.f32.mrb[21].mxu0  ;;  %3358 = vmatprep.mubr.bf16.mxu1 %v7991_v51  ;;  %3510 = vmatpush1.bf16.msra.mxu1 %v6429_v60 }
 0x334   :  { %v5757_v13 = vadd.f32 %v2781_v24, %v7279_v29  ;;  %v2783_v17 = vpop.f32.mrb[22].mxu0  ;;  %3511 = vmatprep.subr.bf16.mxu1 %v6434_v54 }
 0x335   :  { %v5758_v3 = vadd.f32 %v2783_v17, %v7281_v30  ;;  %v2785_v45 = vpop.f32.mrb[23].mxu0 }
 0x336   :  { %v3074_v14 = vmax.f32 %v5756_v49, %v5757_v13  ;;  %v5759_v4 = vadd.f32 %v2785_v45, %v7283_v31  ;;  %v6449_v49 = vld [vmem:[#allocation4 + $0x64] ss:$8 sps:$4 sm:$0xff]   ;;  %v6452_v45 = vld [vmem:[#allocation4 + $0x74] ss:$8 sps:$4 sm:$0xff]  }
 0x337   :  { %3512 = vmatpush1.bf16.msra.mxu1 %v6432_v25 }
 0x338   :  { %v3116_v6 = vmax.f32 %v3072_v21, %v3074_v14  ;;  %v3075_v28 = vmax.f32 %v5758_v3, %v5759_v4  ;;  %3513 = vmatprep.subr.bf16.mxu1 %v6437_v26  ;;  %v6447_v26 = vld [vmem:[#allocation4 + $0x60] ss:$8 sps:$4 sm:$0xff]  }
 0x33a   :  { %v3117_v2 = vmax.f32 %v3073_v22, %v3075_v28  ;;  %v2789_v16 = vpop.f32.mrb[24].mxu0  ;;  %v3147_v8 = vadd.f32 %v7516_v5, %v3116_v6  ;;  %v6450_v28 = vld [vmem:[#allocation4 + $0x70] ss:$8 sps:$4 sm:$0xff]  }
 0x33b   :  { %v5760_v29 = vadd.f32 %v2789_v16, %v7286_v32  ;;  %v2791_v58 = vpop.f32.mrb[25].mxu0  ;;  %3514 = vmatpush1.bf16.msra.mxu1 %v6435_v15  ;;  %v6441_v32 = vld [vmem:[#allocation4 + $0x40] ss:$8 sps:$4 sm:$0xff]  }
 0x33c   :  { %v5761_v30 = vadd.f32 %v2791_v58, %v7289_v33  ;;  %v2793_v9 = vpop.f32.mrb[26].mxu0  ;;  %v3148_v31 = vadd.f32 %v7516_v5, %v3117_v2  ;;  %3515 = vmatprep.subr.bf16.mxu1 %v6440_v63  ;;  %v3171_v12 = vmax.f32 %v3147_v8, 0.0  ;;  %v6446_v33 = vld [vmem:[#allocation4 + $0x54] ss:$8 sps:$4 sm:$0xff]   ;;  %v6455_v2 = vld [vmem:[#allocation4 + $0x104] ss:$8 sps:$4 sm:$0xff]  }
 0x33d   :  { %v5762_v19 = vadd.f32 %v2793_v9, %v7291_v34  ;;  %v2795_v10 = vpop.f32.mrb[27].mxu0  ;;  %v6444_v34 = vld [vmem:[#allocation4 + $0x50] ss:$8 sps:$4 sm:$0xff]  }
 0x33e   :  { %v3076_v20 = vmax.f32 %v5760_v29, %v5761_v30  ;;  %v5763_v56 = vadd.f32 %v2795_v10, %v7293_v35  ;;  %v3172_v11 = vmax.f32 %v3148_v31, 0.0 }
 0x33f   :  { %3516 = vmatpush1.bf16.msra.mxu1 %v6438_v0 }
 0x340   :  { %v3077_v21 = vmax.f32 %v5762_v19, %v5763_v56  ;;  %v7550_v40 = vpack.c.bf16 %v3172_v11, %v3171_v12  ;;  %3517 = vmatprep.subr.bf16.mxu1 %v6443_v18 }
 0x342   :  { %v2799_v60 = vpop.f32.mrb[28].mxu0  ;;  %3359 = vmatmul.mubr.bf16.gmra.mrb[100].mxu1 %v7550_v40 }
 0x343   :  { %v5764_v22 = vadd.f32 %v2799_v60, %v7298_v37  ;;  %v2801_v54 = vpop.f32.mrb[29].mxu0  ;;  %3368 = vmatprep.mubr.bf16.mxu1 %v7991_v51  ;;  %3518 = vmatpush1.bf16.msra.mxu1 %v6441_v32 }
 0x344   :  { %v5765_v35 = vadd.f32 %v2801_v54, %v7300_v38  ;;  %v2803_v23 = vpop.f32.mrb[30].mxu0  ;;  %3519 = vmatprep.subr.bf16.mxu1 %v6446_v33 }
 0x345   :  { %v5766_v24 = vadd.f32 %v2803_v23, %v7302_v39  ;;  %v2805_v25 = vpop.f32.mrb[31].mxu0 }
 0x346   :  { %v3078_v13 = vmax.f32 %v5764_v22, %v5765_v35  ;;  %v5767_v17 = vadd.f32 %v2805_v25, %v7311_v41 }
 0x347   :  { %3520 = vmatpush1.bf16.msra.mxu1 %v6444_v34 }
 0x348   :  { %v3118_v3 = vmax.f32 %v3076_v20, %v3078_v13  ;;  %v3079_v37 = vmax.f32 %v5766_v24, %v5767_v17  ;;  %3521 = vmatprep.subr.bf16.mxu1 %v6449_v49 }
 0x34a   :  { %v3149_v14 = vadd.f32 %v7516_v5, %v3118_v3  ;;  %v3119_v4 = vmax.f32 %v3077_v21, %v3079_v37  ;;  %v2809_v15 = vpop.f32.mrb[32].mxu0 }
 0x34b   :  { %v5768_v38 = vadd.f32 %v2809_v15, %v7317_v43  ;;  %v2811_v6 = vpop.f32.mrb[33].mxu0  ;;  %3522 = vmatpush1.bf16.msra.mxu1 %v6447_v26 }
 0x34c   :  { %v3150_v39 = vadd.f32 %v7516_v5, %v3119_v4  ;;  %v5769_v63 = vadd.f32 %v2811_v6, %v7320_v44  ;;  %v2813_v41 = vpop.f32.mrb[34].mxu0  ;;  %3523 = vmatprep.subr.bf16.mxu1 %v6452_v45  ;;  %v3173_v29 = vmax.f32 %v3149_v14, 0.0  ;;  %v7992_v6 = vld [vmem:[#allocation8_spill] sm:$0xff] }
 0x34d   :  { %v5770_v16 = vadd.f32 %v2813_v41, %v7322_v46  ;;  %v2815_v8 = vpop.f32.mrb[35].mxu0 }
 0x34e   :  { %v3174_v58 = vmax.f32 %v3150_v39, 0.0  ;;  %v3080_v0 = vmax.f32 %v5768_v38, %v5769_v63  ;;  %v5771_v30 = vadd.f32 %v2815_v8, %v7324_v48  ;;  %v7993_v63 = vld [vmem:[#allocation9_spill] sm:$0xff] }
 0x34f   :  { %3524 = vmatpush1.bf16.msra.mxu1 %v6450_v28 }
 0x350   :  { %v3081_v43 = vmax.f32 %v5770_v16, %v5771_v30  ;;  %v7564_v9 = vpack.c.bf16 %v3174_v58, %v3173_v29  ;;  %3719 = vmatprep.subr.bf16.mxu1 %v6455_v2  ;;  %v7994_v2 = vld [vmem:[#allocation10_spill] sm:$0xff]  ;;  %v7995_v58 = vld [vmem:[#allocation11_spill] sm:$0xff] }
 0x352   :  { %v2819_v31 = vpop.f32.mrb[36].mxu0  ;;  %3369 = vmatmul.mubr.bf16.gmra.mrb[104].mxu1 %v7564_v9 }
 0x353   :  { %v5772_v44 = vadd.f32 %v2819_v31, %v7330_v52  ;;  %v2821_v18 = vpop.f32.mrb[37].mxu0  ;;  %3378 = vmatprep.mubr.bf16.mxu1 %v7991_v51 }
 0x354   :  { %v5773_v46 = vadd.f32 %v2821_v18, %v7333_v53  ;;  %v2823_v19 = vpop.f32.mrb[38].mxu0 }
 0x355   :  { %v5774_v10 = vadd.f32 %v2823_v19, %v7335_v55  ;;  %v2825_v20 = vpop.f32.mrb[39].mxu0  ;;  %v7997_v19 = vld [vmem:[#allocation13_spill] sm:$0xff] }
 0x356   :  { %v3082_v48 = vmax.f32 %v5772_v44, %v5773_v46  ;;  %v5775_v56 = vadd.f32 %v2825_v20, %v7337_v57  ;;  %v7996_v44 = vld [vmem:[#allocation12_spill] sm:$0xff] }
 0x358   :  { %v3120_v12 = vmax.f32 %v3080_v0, %v3082_v48  ;;  %v3083_v11 = vmax.f32 %v5774_v10, %v5775_v56  ;;  %v7998_v48 = vld [vmem:[#allocation14_spill] sm:$0xff] }
 0x35a   :  { %v3151_v32 = vadd.f32 %v7516_v5, %v3120_v12  ;;  %v3121_v21 = vmax.f32 %v3081_v43, %v3083_v11  ;;  %v2829_v33 = vpop.f32.mrb[40].mxu0 }
 0x35b   :  { %v5776_v52 = vadd.f32 %v2829_v33, %v7343_v61  ;;  %v2831_v60 = vpop.f32.mrb[41].mxu0 }
 0x35c   :  { %v3152_v22 = vadd.f32 %v7516_v5, %v3121_v21  ;;  %v5777_v53 = vadd.f32 %v2831_v60, %v7346_v62  ;;  %v2833_v54 = vpop.f32.mrb[42].mxu0  ;;  %v3175_v35 = vmax.f32 %v3151_v32, 0.0  ;;  %v7999_v32 = vld [vmem:[#allocation15_spill] sm:$0xff] }
 0x35d   :  { %v5778_v55 = vadd.f32 %v2833_v54, %v7348_v1  ;;  %v2835_v34 = vpop.f32.mrb[43].mxu0  ;;  %v8000_v54 = vld [vmem:[#allocation16_spill] sm:$0xff] }
 0x35e   :  { %v3176_v23 = vmax.f32 %v3152_v22, 0.0  ;;  %v3084_v57 = vmax.f32 %v5776_v52, %v5777_v53  ;;  %v5779_v49 = vadd.f32 %v2835_v34, %v7350_v7 }
 0x360   :  { %v7578_v24 = vpack.c.bf16 %v3176_v23, %v3175_v35  ;;  %v3085_v25 = vmax.f32 %v5778_v55, %v5779_v49  ;;  %v8001_v23 = vld [vmem:[#allocation17_spill] sm:$0xff] }
 0x362   :  { %v2839_v13 = vpop.f32.mrb[44].mxu0  ;;  %3379 = vmatmul.mubr.bf16.gmra.mrb[108].mxu1 %v7578_v24 }
 0x363   :  { %v5780_v61 = vadd.f32 %v2839_v13, %v7356_v27  ;;  %v2841_v17 = vpop.f32.mrb[45].mxu0  ;;  %3388 = vmatprep.mubr.bf16.mxu1 %v7991_v51 }
 0x364   :  { %v5781_v62 = vadd.f32 %v2841_v17, %v7359_v36  ;;  %v2843_v1 = vpop.f32.mrb[46].mxu0 }
 0x365   :  { %v5782_v26 = vadd.f32 %v2843_v1, %v7361_v42  ;;  %v2845_v3 = vpop.f32.mrb[47].mxu0 }
 0x366   :  { %v3086_v37 = vmax.f32 %v5780_v61, %v5781_v62  ;;  %v5783_v7 = vadd.f32 %v2845_v3, %v7363_v47 }
 0x368   :  { %v3122_v45 = vmax.f32 %v3084_v57, %v3086_v37  ;;  %v3087_v14 = vmax.f32 %v5782_v26, %v5783_v7  ;;  %v8003_v26 = vld [vmem:[#allocation19_spill] sm:$0xff] }
 0x36a   :  { %v3153_v4 = vadd.f32 %v7516_v5, %v3122_v45  ;;  %v3123_v15 = vmax.f32 %v3085_v25, %v3087_v14  ;;  %v2849_v38 = vpop.f32.mrb[48].mxu0  ;;  %v8002_v25 = vld [vmem:[#allocation18_spill] sm:$0xff]  ;;  %v8004_v14 = vld [vmem:[#allocation20_spill] sm:$0xff] }
 0x36b   :  { %v5784_v27 = vadd.f32 %v2849_v38, %v7992_v6  ;;  %v2851_v28 = vpop.f32.mrb[49].mxu0  ;;  %v8005_v38 = vld [vmem:[#allocation21_spill] sm:$0xff] }
 0x36c   :  { %v3154_v39 = vadd.f32 %v7516_v5, %v3123_v15  ;;  %v5785_v36 = vadd.f32 %v2851_v28, %v7993_v63  ;;  %v2853_v41 = vpop.f32.mrb[50].mxu0  ;;  %v3177_v8 = vmax.f32 %v3153_v4, 0.0  ;;  %v8006_v28 = vld [vmem:[#allocation22_spill] sm:$0xff] }
 0x36d   :  { %v5786_v42 = vadd.f32 %v2853_v41, %v7994_v2  ;;  %v2855_v16 = vpop.f32.mrb[51].mxu0  ;;  %v8007_v41 = vld [vmem:[#allocation23_spill] sm:$0xff] }
 0x36e   :  { %v3178_v29 = vmax.f32 %v3154_v39, 0.0  ;;  %v3088_v47 = vmax.f32 %v5784_v27, %v5785_v36  ;;  %v5787_v0 = vadd.f32 %v2855_v16, %v7995_v58  ;;  %v8008_v58 = vld [vmem:[#allocation24_spill] sm:$0xff] }
 0x370   :  { %v7592_v30 = vpack.c.bf16 %v3178_v29, %v3177_v8  ;;  %v3089_v43 = vmax.f32 %v5786_v42, %v5787_v0 }
 0x372   :  { %v2859_v31 = vpop.f32.mrb[52].mxu0  ;;  %3389 = vmatmul.mubr.bf16.gmra.mrb[112].mxu1 %v7592_v30 }
 0x373   :  { %v5788_v18 = vadd.f32 %v2859_v31, %v7996_v44  ;;  %v2861_v46 = vpop.f32.mrb[53].mxu0  ;;  %3398 = vmatprep.mubr.bf16.mxu1 %v7991_v51  ;;  %v8009_v44 = vld [vmem:[#allocation25_spill] sm:$0xff] }
 0x374   :  { %v5789_v10 = vadd.f32 %v2861_v46, %v7997_v19  ;;  %v2863_v20 = vpop.f32.mrb[54].mxu0  ;;  %v8010_v19 = vld [vmem:[#allocation26_spill] sm:$0xff] }
 0x375   :  { %v5790_v56 = vadd.f32 %v2863_v20, %v7998_v48  ;;  %v2865_v12 = vpop.f32.mrb[55].mxu0 }
 0x376   :  { %v3090_v11 = vmax.f32 %v5788_v18, %v5789_v10  ;;  %v5791_v21 = vadd.f32 %v2865_v12, %v7999_v32 }
 0x378   :  { %v3124_v33 = vmax.f32 %v3088_v47, %v3090_v11  ;;  %v3091_v52 = vmax.f32 %v5790_v56, %v5791_v21  ;;  %v8011_v11 = vld [vmem:[#allocation27_spill] sm:$0xff] }
 0x37a   :  { %v3155_v60 = vadd.f32 %v7516_v5, %v3124_v33  ;;  %v3125_v22 = vmax.f32 %v3089_v43, %v3091_v52  ;;  %v2869_v53 = vpop.f32.mrb[56].mxu0 }
 0x37b   :  { %v5792_v55 = vadd.f32 %v2869_v53, %v8000_v54  ;;  %v2871_v34 = vpop.f32.mrb[57].mxu0  ;;  %v8013_v54 = vld [vmem:[#allocation29_spill] sm:$0xff] }
 0x37c   :  { %v3156_v35 = vadd.f32 %v7516_v5, %v3125_v22  ;;  %v5793_v57 = vadd.f32 %v2871_v34, %v8001_v23  ;;  %v2873_v49 = vpop.f32.mrb[58].mxu0  ;;  %v3179_v17 = vmax.f32 %v3155_v60, 0.0  ;;  %v8012_v60 = vld [vmem:[#allocation28_spill] sm:$0xff] }
 0x37d   :  { %v5794_v13 = vadd.f32 %v2873_v49, %v8002_v25  ;;  %v2875_v61 = vpop.f32.mrb[59].mxu0  ;;  %v8015_v25 = vld [vmem:[#allocation31_spill] sm:$0xff] }
 0x37e   :  { %v3180_v62 = vmax.f32 %v3156_v35, 0.0  ;;  %v3092_v1 = vmax.f32 %v5792_v55, %v5793_v57  ;;  %v5795_v3 = vadd.f32 %v2875_v61, %v8003_v26  ;;  %v8014_v35 = vld [vmem:[#allocation30_spill] sm:$0xff] }
 0x380   :  { %v7606_v37 = vpack.c.bf16 %v3180_v62, %v3179_v17  ;;  %v3093_v7 = vmax.f32 %v5794_v13, %v5795_v3  ;;  %v8016_v3 = vld [vmem:[#allocation32_spill] sm:$0xff] }
 0x382   :  { %v2879_v45 = vpop.f32.mrb[60].mxu0  ;;  %3399 = vmatmul.mubr.bf16.gmra.mrb[116].mxu1 %v7606_v37 }
 0x383   :  { %v5796_v4 = vadd.f32 %v2879_v45, %v8004_v14  ;;  %v2881_v15 = vpop.f32.mrb[61].mxu0  ;;  %3408 = vmatprep.mubr.bf16.mxu1 %v7991_v51 }
 0x384   :  { %v5797_v6 = vadd.f32 %v2881_v15, %v8005_v38  ;;  %v2883_v27 = vpop.f32.mrb[62].mxu0 }
 0x385   :  { %v5798_v39 = vadd.f32 %v2883_v27, %v8006_v28  ;;  %v2885_v63 = vpop.f32.mrb[63].mxu0 }
 0x386   :  { %v3094_v36 = vmax.f32 %v5796_v4, %v5797_v6  ;;  %v5799_v2 = vadd.f32 %v2885_v63, %v8007_v41  ;;  %v8017_v4 = vld [vmem:[#allocation33_spill] sm:$0xff]  ;;  %v8018_v6 = vld [vmem:[#allocation34_spill] sm:$0xff]  ;;  %v8019_v41 = vld [vmem:[#allocation35_spill] sm:$0xff] }
 0x388   :  { %v3126_v42 = vmax.f32 %v3092_v1, %v3094_v36  ;;  %v3095_v16 = vmax.f32 %v5798_v39, %v5799_v2 }
 0x38a   :  { %v3157_v8 = vadd.f32 %v7516_v5, %v3126_v42  ;;  %v3127_v29 = vmax.f32 %v3093_v7, %v3095_v16  ;;  %v2889_v47 = vpop.f32.mrb[64].mxu0 }
 0x38b   :  { %v5800_v0 = vadd.f32 %v2889_v47, %v8008_v58  ;;  %v2891_v43 = vpop.f32.mrb[65].mxu0 }
 0x38c   :  { %v3158_v31 = vadd.f32 %v7516_v5, %v3127_v29  ;;  %v5801_v18 = vadd.f32 %v2891_v43, %v8009_v44  ;;  %v2893_v46 = vpop.f32.mrb[66].mxu0  ;;  %v3181_v48 = vmax.f32 %v3157_v8, 0.0  ;;  %v8020_v29 = vld [vmem:[#allocation36_spill] sm:$0xff]  ;;  %v8022_v44 = vld [vmem:[#allocation38_spill] sm:$0xff] }
 0x38d   :  { %v5802_v10 = vadd.f32 %v2893_v46, %v8010_v19  ;;  %v2895_v20 = vpop.f32.mrb[67].mxu0 }
 0x38e   :  { %v3182_v56 = vmax.f32 %v3158_v31, 0.0  ;;  %v3096_v12 = vmax.f32 %v5800_v0, %v5801_v18  ;;  %v5803_v32 = vadd.f32 %v2895_v20, %v8011_v11  ;;  %v8021_v0 = vld [vmem:[#allocation37_spill] sm:$0xff]  ;;  %v6458_v11 = vld [vmem:[#allocation4 + $0x114] ss:$8 sps:$4 sm:$0xff]  }
 0x390   :  { %v7620_v21 = vpack.c.bf16 %v3182_v56, %v3181_v48  ;;  %v3097_v33 = vmax.f32 %v5802_v10, %v5803_v32  ;;  %v8023_v10 = vld [vmem:[#allocation39_spill] sm:$0xff]  ;;  %v6453_v48 = vld [vmem:[#allocation4 + $0x100] ss:$8 sps:$4 sm:$0xff]  }
 0x392   :  { %v2899_v52 = vpop.f32.mrb[68].mxu0  ;;  %3409 = vmatmul.mubr.bf16.gmra.mrb[120].mxu1 %v7620_v21 }
 0x393   :  { %v5804_v22 = vadd.f32 %v2899_v52, %v8012_v60  ;;  %v2901_v53 = vpop.f32.mrb[69].mxu0  ;;  %3418 = vmatprep.mubr.bf16.mxu1 %v7991_v51  ;;  %v8024_v60 = vld [vmem:[#allocation40_spill] sm:$0xff] }
 0x394   :  { %v5805_v55 = vadd.f32 %v2901_v53, %v8013_v54  ;;  %v2903_v34 = vpop.f32.mrb[70].mxu0  ;;  %v6456_v54 = vld [vmem:[#allocation4 + $0x110] ss:$8 sps:$4 sm:$0xff]  }
 0x395   :  { %v5806_v23 = vadd.f32 %v2903_v34, %v8014_v35  ;;  %v2905_v57 = vpop.f32.mrb[71].mxu0 }
 0x396   :  { %v3098_v49 = vmax.f32 %v5804_v22, %v5805_v55  ;;  %v5807_v13 = vadd.f32 %v2905_v57, %v8015_v25  ;;  %v8025_v55 = vld [vmem:[#allocation41_spill] sm:$0xff] }
 0x398   :  { %v3128_v61 = vmax.f32 %v3096_v12, %v3098_v49  ;;  %v3099_v17 = vmax.f32 %v5806_v23, %v5807_v13  ;;  %v6461_v23 = vld [vmem:[#allocation4 + $0x124] ss:$8 sps:$4 sm:$0xff]   ;;  %v8026_v49 = vld [vmem:[#allocation42_spill] sm:$0xff] }
 0x39a   :  { %v3159_v62 = vadd.f32 %v7516_v5, %v3128_v61  ;;  %v3129_v1 = vmax.f32 %v3097_v33, %v3099_v17  ;;  %v2909_v26 = vpop.f32.mrb[72].mxu0  ;;  %v8027_v61 = vld [vmem:[#allocation43_spill] sm:$0xff] }
 0x39b   :  { %v5808_v7 = vadd.f32 %v2909_v26, %v8016_v3  ;;  %v2911_v45 = vpop.f32.mrb[73].mxu0  ;;  %v6459_v26 = vld [vmem:[#allocation4 + $0x120] ss:$8 sps:$4 sm:$0xff]  }
 0x39c   :  { %v3160_v14 = vadd.f32 %v7516_v5, %v3129_v1  ;;  %v5809_v15 = vadd.f32 %v2911_v45, %v8017_v4  ;;  %v2913_v38 = vpop.f32.mrb[74].mxu0  ;;  %v3183_v39 = vmax.f32 %v3159_v62, 0.0  ;;  %v8028_v4 = vld [vmem:[#allocation44_spill] sm:$0xff] }
 0x39d   :  { %v5810_v27 = vadd.f32 %v2913_v38, %v8018_v6  ;;  %v2915_v28 = vpop.f32.mrb[75].mxu0  ;;  %v6462_v6 = vld [vmem:[#allocation4 + $0x130] ss:$8 sps:$4 sm:$0xff]  }
 0x39e   :  { %v3184_v63 = vmax.f32 %v3160_v14, 0.0  ;;  %v3100_v36 = vmax.f32 %v5808_v7, %v5809_v15  ;;  %v5811_v2 = vadd.f32 %v2915_v28, %v8019_v41  ;;  %v6464_v7 = vld [vmem:[#allocation4 + $0x134] ss:$8 sps:$4 sm:$0xff]  }
 0x3a0   :  { %v3101_v42 = vmax.f32 %v5810_v27, %v5811_v2  ;;  %v7634_v16 = vpack.c.bf16 %v3184_v63, %v3183_v39  ;;  %v8029_v27 = vld [vmem:[#allocation45_spill] sm:$0xff] }
 0x3a1   :  { %v6467_v63 = vld [vmem:[#allocation4 + $0x144] ss:$8 sps:$4 sm:$0xff]  }
 0x3a2   :  { %v2919_v8 = vpop.f32.mrb[76].mxu0  ;;  %3419 = vmatmul.mubr.bf16.gmra.mrb[124].mxu1 %v7634_v16 }
 0x3a3   :  { %v5812_v47 = vadd.f32 %v2919_v8, %v8020_v29  ;;  %v2921_v58 = vpop.f32.mrb[77].mxu0  ;;  %3541 = vmatprep.mubr.bf16.mxu1 %v7991_v51  ;;  %v8031_v8 = vld [vmem:[#allocation47_spill] sm:$0xff] }
 0x3a4   :  { %v5813_v43 = vadd.f32 %v2921_v58, %v8021_v0  ;;  %v2923_v31 = vpop.f32.mrb[78].mxu0  ;;  %v6470_v0 = vld [vmem:[#allocation4 + $0x154] ss:$8 sps:$4 sm:$0xff]  }
 0x3a5   :  { %v5814_v18 = vadd.f32 %v2923_v31, %v8022_v44  ;;  %v2925_v46 = vpop.f32.mrb[79].mxu0 }
 0x3a6   :  { %v3102_v19 = vmax.f32 %v5812_v47, %v5813_v43  ;;  %v5815_v20 = vadd.f32 %v2925_v46, %v8023_v10  ;;  %v6468_v10 = vld [vmem:[#allocation4 + $0x150] ss:$8 sps:$4 sm:$0xff]  }
 0x3a8   :  { %v3130_v56 = vmax.f32 %v3100_v36, %v3102_v19  ;;  %v3103_v12 = vmax.f32 %v5814_v18, %v5815_v20  ;;  %v8030_v36 = vld [vmem:[#allocation46_spill] sm:$0xff]  ;;  %v8032_v18 = vld [vmem:[#allocation48_spill] sm:$0xff]  ;;  %v8033_v20 = vld [vmem:[#allocation49_spill] sm:$0xff] }
 0x3aa   :  { %v3131_v32 = vmax.f32 %v3101_v42, %v3103_v12  ;;  %v2929_v33 = vpop.f32.mrb[80].mxu0  ;;  %3542 = vmatmul.mubr.bf16.vlgmr.msra.gmra.mrb[96].mxu1 %v7524_v59  ;;  %v3161_v52 = vadd.f32 %v7516_v5, %v3130_v56  ;;  %v6473_v12 = vld [vmem:[#allocation4 + $0x164] ss:$8 sps:$4 sm:$0xff]  }
 0x3ab   :  { %v5816_v22 = vadd.f32 %v2929_v33, %v8024_v60  ;;  %v2931_v53 = vpop.f32.mrb[81].mxu0  ;;  %3720 = vmatpush1.bf16.msra.mxu1 %v6453_v48  ;;  %3551 = vmatprep.mubr.bf16.mxu1 %v7991_v51 }
 0x3ac   :  { %v5817_v34 = vadd.f32 %v2931_v53, %v8025_v55  ;;  %v2933_v35 = vpop.f32.mrb[82].mxu0  ;;  %3721 = vmatprep.subr.bf16.mxu1 %v6458_v11  ;;  %v3162_v57 = vadd.f32 %v7516_v5, %v3131_v32  ;;  %v3185_v62 = vmax.f32 %v3161_v52, 0.0  ;;  %v8034_v32 = vld [vmem:[#allocation50_spill] sm:$0xff] }
 0x3ad   :  { %v5818_v25 = vadd.f32 %v2933_v35, %v8026_v49  ;;  %v2935_v13 = vpop.f32.mrb[83].mxu0 }
 0x3ae   :  { %v3104_v59 = vmax.f32 %v5816_v22, %v5817_v34  ;;  %v5819_v17 = vadd.f32 %v2935_v13, %v8027_v61  ;;  %v3186_v1 = vmax.f32 %v3162_v57, 0.0  ;;  %v8035_v22 = vld [vmem:[#allocation51_spill] sm:$0xff]  ;;  %v6471_v34 = vld [vmem:[#allocation4 + $0x160] ss:$8 sps:$4 sm:$0xff]  }
 0x3af   :  { %3722 = vmatpush1.bf16.msra.mxu1 %v6456_v54  ;;  %v6474_v61 = vld [vmem:[#allocation4 + $0x170] ss:$8 sps:$4 sm:$0xff]  }
 0x3b0   :  { %v3105_v3 = vmax.f32 %v5818_v25, %v5819_v17  ;;  %3723 = vmatprep.subr.bf16.mxu1 %v6461_v23  ;;  %v7650_v45 = vpack.c.bf16 %v3186_v1, %v3185_v62  ;;  %v6476_v23 = vld [vmem:[#allocation4 + $0x174] ss:$8 sps:$4 sm:$0xff]   ;;  %v8036_v25 = vld [vmem:[#allocation52_spill] sm:$0xff]  ;;  %v8037_v17 = vld [vmem:[#allocation53_spill] sm:$0xff] }
 0x3b2   :  { %v2939_v14 = vpop.f32.mrb[84].mxu0  ;;  %3552 = vmatmul.mubr.bf16.gmra.mrb[100].mxu1 %v7536_v50  ;;  %v6465_v50 = vld [vmem:[#allocation4 + $0x140] ss:$8 sps:$4 sm:$0xff]  }
 0x3b3   :  { %v5820_v15 = vadd.f32 %v2939_v14, %v8028_v4  ;;  %v2941_v38 = vpop.f32.mrb[85].mxu0  ;;  %3561 = vmatprep.mubr.bf16.mxu1 %v7991_v51  ;;  %3724 = vmatpush1.bf16.msra.mxu1 %v6459_v26  ;;  %v6479_v26 = vld [vmem:[#allocation4 + $0x184] ss:$8 sps:$4 sm:$0xff]  }
 0x3b4   :  { %v5821_v28 = vadd.f32 %v2941_v38, %v8029_v27  ;;  %v2943_v39 = vpop.f32.mrb[86].mxu0  ;;  %3725 = vmatprep.subr.bf16.mxu1 %v6464_v7 }
 0x3b5   :  { %v5822_v41 = vadd.f32 %v2943_v39, %v8030_v36  ;;  %v2945_v2 = vpop.f32.mrb[87].mxu0 }
 0x3b6   :  { %v3106_v42 = vmax.f32 %v5820_v15, %v5821_v28  ;;  %v5823_v29 = vadd.f32 %v2945_v2, %v8031_v8  ;;  %v8039_v15 = vld [vmem:[#allocation55_spill] sm:$0xff] }
 0x3b7   :  { %3726 = vmatpush1.bf16.msra.mxu1 %v6462_v6  ;;  %v6482_v8 = vld [vmem:[#allocation4 + $0x194] ss:$8 sps:$4 sm:$0xff]  }
 0x3b8   :  { %v3132_v47 = vmax.f32 %v3104_v59, %v3106_v42  ;;  %v3107_v58 = vmax.f32 %v5822_v41, %v5823_v29  ;;  %3727 = vmatprep.subr.bf16.mxu1 %v6467_v63  ;;  %v6477_v42 = vld [vmem:[#allocation4 + $0x180] ss:$8 sps:$4 sm:$0xff]   ;;  %v6485_v29 = vld [vmem:[#allocation4 + $0x1a4] ss:$8 sps:$4 sm:$0xff]  }
 0x3ba   :  { %v3133_v43 = vmax.f32 %v3105_v3, %v3107_v58  ;;  %v2949_v31 = vpop.f32.mrb[88].mxu0  ;;  %3562 = vmatmul.mubr.bf16.gmra.mrb[104].mxu1 %v7550_v40  ;;  %v3163_v44 = vadd.f32 %v7516_v5, %v3132_v47  ;;  %v8038_v3 = vld [vmem:[#allocation54_spill] sm:$0xff] }
 0x3bb   :  { %v5824_v46 = vadd.f32 %v2949_v31, %v8032_v18  ;;  %v2951_v19 = vpop.f32.mrb[89].mxu0  ;;  %3571 = vmatprep.mubr.bf16.mxu1 %v7991_v51  ;;  %3728 = vmatpush1.bf16.msra.mxu1 %v6465_v50  ;;  %v6483_v50 = vld [vmem:[#allocation4 + $0x1a0] ss:$8 sps:$4 sm:$0xff]   ;;  %v6488_v47 = vld [vmem:[#allocation4 + $0x1b4] ss:$8 sps:$4 sm:$0xff]  }
 0x3bc   :  { %v5825_v48 = vadd.f32 %v2951_v19, %v8033_v20  ;;  %v2953_v56 = vpop.f32.mrb[90].mxu0  ;;  %3729 = vmatprep.subr.bf16.mxu1 %v6470_v0  ;;  %v3164_v11 = vadd.f32 %v7516_v5, %v3133_v43  ;;  %v3187_v54 = vmax.f32 %v3163_v44, 0.0  ;;  %v6486_v58 = vld [vmem:[#allocation4 + $0x1b0] ss:$8 sps:$4 sm:$0xff]   ;;  %v6491_v0 = vld [vmem:[#allocation4 + $0x1c4] ss:$8 sps:$4 sm:$0xff]  }
 0x3bd   :  { %v5826_v33 = vadd.f32 %v2953_v56, %v8034_v32  ;;  %v2955_v52 = vpop.f32.mrb[91].mxu0  ;;  %v6494_v43 = vld [vmem:[#allocation4 + $0x1d4] ss:$8 sps:$4 sm:$0xff]   ;;  %v6492_v31 = vld [vmem:[#allocation4 + $0x1d0] ss:$8 sps:$4 sm:$0xff]  }
 0x3be   :  { %v3108_v60 = vmax.f32 %v5824_v46, %v5825_v48  ;;  %v5827_v53 = vadd.f32 %v2955_v52, %v8035_v22  ;;  %v3188_v55 = vmax.f32 %v3164_v11, 0.0  ;;  %v6497_v44 = vld [vmem:[#allocation4 + $0x1e4] ss:$8 sps:$4 sm:$0xff]   ;;  %v6495_v18 = vld [vmem:[#allocation4 + $0x1e0] ss:$8 sps:$4 sm:$0xff]  }
 0x3bf   :  { %3730 = vmatpush1.bf16.msra.mxu1 %v6468_v10  ;;  %v6500_v46 = vld [vmem:[#allocation4 + $0x1f4] ss:$8 sps:$4 sm:$0xff]   ;;  %v6498_v19 = vld [vmem:[#allocation4 + $0x1f0] ss:$8 sps:$4 sm:$0xff]   ;;  %v6503_v10 = vld [vmem:[#allocation4 + $0x204] ss:$8 sps:$4 sm:$0xff]  }
 0x3c0   :  { %v3109_v35 = vmax.f32 %v5826_v33, %v5827_v53  ;;  %3731 = vmatprep.subr.bf16.mxu1 %v6473_v12  ;;  %v7666_v57 = vpack.c.bf16 %v3188_v55, %v3187_v54  ;;  %v6501_v20 = vld [vmem:[#allocation4 + $0x200] ss:$8 sps:$4 sm:$0xff]   ;;  %v6506_v48 = vld [vmem:[#allocation4 + $0x214] ss:$8 sps:$4 sm:$0xff]   ;;  %v6504_v56 = vld [vmem:[#allocation4 + $0x210] ss:$8 sps:$4 sm:$0xff]  }
 0x3c1   :  { %v6509_v12 = vld [vmem:[#allocation4 + $0x224] ss:$8 sps:$4 sm:$0xff]   ;;  %v6507_v11 = vld [vmem:[#allocation4 + $0x220] ss:$8 sps:$4 sm:$0xff]   ;;  %v6512_v32 = vld [vmem:[#allocation4 + $0x234] ss:$8 sps:$4 sm:$0xff]  }
 0x3c2   :  { %v2959_v49 = vpop.f32.mrb[92].mxu0  ;;  %3572 = vmatmul.mubr.bf16.gmra.mrb[108].mxu1 %v7564_v9  ;;  %v6510_v33 = vld [vmem:[#allocation4 + $0x230] ss:$8 sps:$4 sm:$0xff]   ;;  %v6515_v52 = vld [vmem:[#allocation4 + $0x244] ss:$8 sps:$4 sm:$0xff]  }
 0x3c3   :  { %v5828_v13 = vadd.f32 %v2959_v49, %v8036_v25  ;;  %v2961_v59 = vpop.f32.mrb[93].mxu0  ;;  %3581 = vmatprep.mubr.bf16.mxu1 %v7991_v51  ;;  %3732 = vmatpush1.bf16.msra.mxu1 %v6471_v34  ;;  %v6516_v22 = vld [vmem:[#allocation4 + $0x250] ss:$8 sps:$4 sm:$0xff]   ;;  %v6521_v53 = vld [vmem:[#allocation4 + $0x264] ss:$8 sps:$4 sm:$0xff]  }
 0x3c4   :  { %v5829_v62 = vadd.f32 %v2961_v59, %v8037_v17  ;;  %v2963_v1 = vpop.f32.mrb[94].mxu0  ;;  %3733 = vmatprep.subr.bf16.mxu1 %v6476_v23  ;;  %v6519_v54 = vld [vmem:[#allocation4 + $0x260] ss:$8 sps:$4 sm:$0xff]   ;;  %v6524_v55 = vld [vmem:[#allocation4 + $0x274] ss:$8 sps:$4 sm:$0xff]  }
 0x3c5   :  { %v5830_v7 = vadd.f32 %v2963_v1, %v8038_v3  ;;  %v2965_v14 = vpop.f32.mrb[95].mxu0  ;;  %v6522_v34 = vld [vmem:[#allocation4 + $0x270] ss:$8 sps:$4 sm:$0xff]   ;;  %v6525_v23 = vld [vmem:[%s7936_s5 + $0x40] sm:$0xff]   ;;  %v6526_v49 = vld [vmem:[%s7936_s5 + $0x48] sm:$0xff]  }
 0x3c6   :  { %v3110_v4 = vmax.f32 %v5828_v13, %v5829_v62  ;;  %v5831_v38 = vadd.f32 %v2965_v14, %v8039_v15  ;;  %v6527_v25 = vld [vmem:[%s7936_s5 + $0x50] sm:$0xff]   ;;  %v7771_v3 = vld [vmem:[%s7935_s4] ss:$0 sm:$0xff] }
 0x3c7   :  { %3734 = vmatpush1.bf16.msra.mxu1 %v6474_v61 }
 0x3c8   :  { %v3134_v6 = vmax.f32 %v3108_v60, %v3110_v4  ;;  %v3111_v27 = vmax.f32 %v5830_v7, %v5831_v38  ;;  %3961 = vmatprep.subr.bf16.mxu1 %v6479_v26  ;;  %v6518_v60 = vld [vmem:[#allocation4 + $0x254] ss:$8 sps:$4 sm:$0xff]  }
 0x3ca   :  { %v3135_v28 = vmax.f32 %v3109_v35, %v3111_v27  ;;  %3582 = vmatmul.mubr.bf16.gmra.mrb[112].mxu1 %v7578_v24  ;;  %v3165_v39 = vadd.f32 %v7516_v5, %v3134_v6  ;;  %v6621_v35 = vmov 0.0  }
 0x3cb   :  { %3591 = vmatprep.mubr.bf16.mxu1 %v7991_v51 }
 0x3cc   :  { %v3166_v63 = vadd.f32 %v7516_v5, %v3135_v28  ;;  %v3189_v36 = vmax.f32 %v3165_v39, 0.0  ;;  %v6480_v5 = vld [vmem:[#allocation4 + $0x190] ss:$8 sps:$4 sm:$0xff]  }
 0x3ce   :  { %v3190_v41 = vmax.f32 %v3166_v63, 0.0 }
 0x3d0   :  { %v7678_v2 = vpack.c.bf16 %v3190_v41, %v3189_v36 }
 0x3d2   :  { %3592 = vmatmul.mubr.bf16.gmra.mrb[116].mxu1 %v7592_v30 }
 0x3d3   :  { %3601 = vmatprep.mubr.bf16.mxu1 %v7991_v51 }
 0x3da   :  { %3602 = vmatmul.mubr.bf16.gmra.mrb[120].mxu1 %v7606_v37 }
 0x3db   :  { %3611 = vmatprep.mubr.bf16.mxu1 %v7991_v51 }
 0x3e2   :  { %3612 = vmatmul.mubr.bf16.gmra.mrb[124].mxu1 %v7620_v21 }
 0x3e3   :  { %3751 = vmatprep.mubr.bf16.mxu1 %v7991_v51 }
 0x3ea   :  { %3752 = vmatmul.mubr.bf16.vlgmr.msra.gmra.mrb[96].mxu1 %v7550_v40  ;;  %v6489_v40 = vld [vmem:[#allocation4 + $0x1c0] ss:$8 sps:$4 sm:$0xff]  }
 0x3eb   :  { %3962 = vmatpush1.bf16.msra.mxu1 %v6477_v42  ;;  %3761 = vmatprep.mubr.bf16.mxu1 %v7991_v51 }
 0x3ec   :  { %3963 = vmatprep.subr.bf16.mxu1 %v6482_v8 }
 0x3ef   :  { %3964 = vmatpush1.bf16.msra.mxu1 %v6480_v5 }
 0x3f0   :  { %3965 = vmatprep.subr.bf16.mxu1 %v6485_v29 }
 0x3f2   :  { %3762 = vmatmul.mubr.bf16.gmra.mrb[100].mxu1 %v7564_v9 }
 0x3f3   :  { %3771 = vmatprep.mubr.bf16.mxu1 %v7991_v51  ;;  %3966 = vmatpush1.bf16.msra.mxu1 %v6483_v50 }
 0x3f4   :  { %3967 = vmatprep.subr.bf16.mxu1 %v6488_v47 }
 0x3f7   :  { %3968 = vmatpush1.bf16.msra.mxu1 %v6486_v58 }
 0x3f8   :  { %3969 = vmatprep.subr.bf16.mxu1 %v6491_v0 }
 0x3fa   :  { %3772 = vmatmul.mubr.bf16.gmra.mrb[104].mxu1 %v7578_v24 }
 0x3fb   :  { %3781 = vmatprep.mubr.bf16.mxu1 %v7991_v51  ;;  %3970 = vmatpush1.bf16.msra.mxu1 %v6489_v40 }
 0x3fc   :  { %3971 = vmatprep.subr.bf16.mxu1 %v6494_v43 }
 0x3ff   :  { %3972 = vmatpush1.bf16.msra.mxu1 %v6492_v31 }
 0x400   :  { %3973 = vmatprep.subr.bf16.mxu1 %v6497_v44 }
 0x402   :  { %3782 = vmatmul.mubr.bf16.gmra.mrb[108].mxu1 %v7592_v30 }
 0x403   :  { %3791 = vmatprep.mubr.bf16.mxu1 %v7991_v51  ;;  %3974 = vmatpush1.bf16.msra.mxu1 %v6495_v18 }
 0x404   :  { %3975 = vmatprep.subr.bf16.mxu1 %v6500_v46 }
 0x407   :  { %3976 = vmatpush1.bf16.msra.mxu1 %v6498_v19 }
 0x408   :  { %4203 = vmatprep.subr.bf16.mxu1 %v6503_v10 }
 0x40a   :  { %3792 = vmatmul.mubr.bf16.gmra.mrb[112].mxu1 %v7606_v37 }
 0x40b   :  { %3801 = vmatprep.mubr.bf16.mxu1 %v7991_v51 }
 0x412   :  { %3802 = vmatmul.mubr.bf16.gmra.mrb[116].mxu1 %v7620_v21 }
 0x413   :  { %3811 = vmatprep.mubr.bf16.mxu1 %v7991_v51 }
 0x41a   :  { %3812 = vmatmul.mubr.bf16.gmra.mrb[120].mxu1 %v7634_v16 }
 0x41b   :  { %3821 = vmatprep.mubr.bf16.mxu1 %v7991_v51 }
 0x422   :  { %3822 = vmatmul.mubr.bf16.gmra.mrb[124].mxu1 %v7650_v45 }
 0x423   :  { %3993 = vmatprep.mubr.bf16.mxu1 %v7991_v51 }
 0x42a   :  { %3994 = vmatmul.mubr.bf16.vlgmr.msra.gmra.mrb[96].mxu1 %v7564_v9  ;;  %v6513_v9 = vld [vmem:[#allocation4 + $0x240] ss:$8 sps:$4 sm:$0xff]  }
 0x42b   :  { %4204 = vmatpush1.bf16.msra.mxu1 %v6501_v20  ;;  %4003 = vmatprep.mubr.bf16.mxu1 %v7991_v51 }
 0x42c   :  { %4205 = vmatprep.subr.bf16.mxu1 %v6506_v48 }
 0x42f   :  { %4206 = vmatpush1.bf16.msra.mxu1 %v6504_v56 }
 0x430   :  { %4207 = vmatprep.subr.bf16.mxu1 %v6509_v12  ;;  %v6533_v12 = vld [vmem:[%s7936_s5] sm:$0xff]  }
 0x432   :  { %4004 = vmatmul.mubr.bf16.gmra.mrb[100].mxu1 %v7578_v24 }
 0x433   :  { %4013 = vmatprep.mubr.bf16.mxu1 %v7991_v51  ;;  %4208 = vmatpush1.bf16.msra.mxu1 %v6507_v11 }
 0x434   :  { %4209 = vmatprep.subr.bf16.mxu1 %v6512_v32 }
 0x437   :  { %4210 = vmatpush1.bf16.msra.mxu1 %v6510_v33  ;;  %v6534_v33 = vld [vmem:[%s7936_s5 + $0x8] sm:$0xff]  }
 0x438   :  { %4211 = vmatprep.subr.bf16.mxu1 %v6515_v52 }
 0x43a   :  { %4014 = vmatmul.mubr.bf16.gmra.mrb[104].mxu1 %v7592_v30 }
 0x43b   :  { %4023 = vmatprep.mubr.bf16.mxu1 %v7991_v51  ;;  %4212 = vmatpush1.bf16.msra.mxu1 %v6513_v9 }
 0x43c   :  { %4213 = vmatprep.subr.bf16.mxu1 %v6518_v60 }
 0x43f   :  { %4214 = vmatpush1.bf16.msra.mxu1 %v6516_v22 }
 0x440   :  { %4215 = vmatprep.subr.bf16.mxu1 %v6521_v53 }
 0x442   :  { %4024 = vmatmul.mubr.bf16.gmra.mrb[108].mxu1 %v7606_v37 }
 0x443   :  { %4033 = vmatprep.mubr.bf16.mxu1 %v7991_v51  ;;  %4216 = vmatpush1.bf16.msra.mxu1 %v6519_v54  ;;  %v6535_v54 = vld [vmem:[%s7936_s5 + $0x10] sm:$0xff]  }
 0x444   :  { %4217 = vmatprep.subr.bf16.mxu1 %v6524_v55 }
 0x447   :  { %4218 = vmatpush1.bf16.msra.mxu1 %v6522_v34 }
 0x448   :  { %5632 = vmatprep.subr.bf16.mxu1 %v6621_v35 }
 0x44a   :  { %4034 = vmatmul.mubr.bf16.gmra.mrb[112].mxu1 %v7620_v21 }
 0x44b   :  { %4043 = vmatprep.mubr.bf16.mxu1 %v7991_v51 }
 0x452   :  { %4044 = vmatmul.mubr.bf16.gmra.mrb[116].mxu1 %v7634_v16 }
 0x453   :  { %4053 = vmatprep.mubr.bf16.mxu1 %v7991_v51 }
 0x45a   :  { %4054 = vmatmul.mubr.bf16.gmra.mrb[120].mxu1 %v7650_v45 }
 0x45b   :  { %4063 = vmatprep.mubr.bf16.mxu1 %v7991_v51 }
 0x462   :  { %4064 = vmatmul.mubr.bf16.gmra.mrb[124].mxu1 %v7666_v57 }
 0x463   :  { %4235 = vmatprep.mubr.bf16.mxu1 %v7991_v51 }
 0x46a   :  { %4236 = vmatmul.mubr.bf16.vlgmr.msra.gmra.mrb[96].mxu1 %v7578_v24  ;;  %v6528_v24 = vld [vmem:[%s7936_s5 + $0x58] sm:$0xff]  }
 0x46b   :  { %4245 = vmatprep.mubr.bf16.mxu1 %v7991_v51  ;;  %5633 = vmatpush3.bf16.msra.mxu1 %v6525_v23 }
 0x46c   :  { %5634 = vmatprep.subr.bf16.mxu1 %v6621_v35 }
 0x46f   :  { %5635 = vmatpush3.bf16.msra.mxu1 %v6526_v49 }
 0x470   :  { %5636 = vmatprep.subr.bf16.mxu1 %v6621_v35 }
 0x472   :  { %4246 = vmatmul.mubr.bf16.gmra.mrb[100].mxu1 %v7592_v30  ;;  %v6529_v30 = vld [vmem:[%s7936_s5 + $0x60] sm:$0xff]  }
 0x473   :  { %4255 = vmatprep.mubr.bf16.mxu1 %v7991_v51  ;;  %5637 = vmatpush3.bf16.msra.mxu1 %v6527_v25  ;;  %v6536_v25 = vld [vmem:[%s7936_s5 + $0x18] sm:$0xff]  }
 0x474   :  { %5638 = vmatprep.subr.bf16.mxu1 %v6621_v35 }
 0x477   :  { %5639 = vmatpush3.bf16.msra.mxu1 %v6528_v24 }
 0x478   :  { %5640 = vmatprep.subr.bf16.mxu1 %v6621_v35 }
 0x47a   :  { %4256 = vmatmul.mubr.bf16.gmra.mrb[104].mxu1 %v7606_v37  ;;  %v6530_v37 = vld [vmem:[%s7936_s5 + $0x68] sm:$0xff]  }
 0x47b   :  { %4265 = vmatprep.mubr.bf16.mxu1 %v7991_v51  ;;  %5641 = vmatpush3.bf16.msra.mxu1 %v6529_v30 }
 0x47c   :  { %5642 = vmatprep.subr.bf16.mxu1 %v6621_v35 }
 0x47f   :  { %5643 = vmatpush3.bf16.msra.mxu1 %v6530_v37 }
 0x480   :  { %5644 = vmatprep.subr.bf16.mxu1 %v6621_v35 }
 0x482   :  { %4266 = vmatmul.mubr.bf16.gmra.mrb[108].mxu1 %v7620_v21  ;;  %v6531_v21 = vld [vmem:[%s7936_s5 + $0x70] sm:$0xff]  }
 0x483   :  { %4275 = vmatprep.mubr.bf16.mxu1 %v7991_v51  ;;  %5645 = vmatpush3.bf16.msra.mxu1 %v6531_v21 }
 0x484   :  { %5646 = vmatprep.subr.bf16.mxu1 %v6621_v35 }
 0x48a   :  { %4276 = vmatmul.mubr.bf16.gmra.mrb[112].mxu1 %v7634_v16 }
 0x48b   :  { %4285 = vmatprep.mubr.bf16.mxu1 %v7991_v51 }
 0x492   :  { %4286 = vmatmul.mubr.bf16.gmra.mrb[116].mxu1 %v7650_v45 }
 0x493   :  { %4295 = vmatprep.mubr.bf16.mxu1 %v7991_v51 }
 0x49a   :  { %4296 = vmatmul.mubr.bf16.gmra.mrb[120].mxu1 %v7666_v57 }
 0x49b   :  { %4305 = vmatprep.mubr.bf16.mxu1 %v7991_v51  ;;  %v6532_v51 = vld [vmem:[%s7936_s5 + $0x78] sm:$0xff]  }
 0x49c   :  { %5647 = vmatpush3.bf16.msra.mxu1 %v6532_v51 }
 0x49d   :  { %5652 = vmatprep.subr.bf16.mxu1 %v6621_v35 }
 0x4a2   :  { %4306 = vmatmul.mubr.bf16.gmra.mrb[124].mxu1 %v7678_v2 }
 0x4a3   :  { %5648 = vmatprep.mubr.msk.bf16.mxu1 %vm6622_vm2, %v6621_v35 }
 0x53d   :  { %v4237_v16 = vpop.f32.mrb[96].mxu1 }
 0x53e   :  { %v4239_v45 = vpop.f32.mrb[97].mxu1 }
 0x53f   :  { %v4348_v57 = vmax.f32 %v4237_v16, %v4239_v45  ;;  %v4241_v13 = vpop.f32.mrb[98].mxu1 }
 0x540   :  { %v4243_v59 = vpop.f32.mrb[99].mxu1 }
 0x541   :  { %v4349_v61 = vmax.f32 %v4241_v13, %v4243_v59  ;;  %v6537_v13 = vld [vmem:[%s7936_s5 + $0x20] sm:$0xff]  }
 0x545   :  { %v4247_v17 = vpop.f32.mrb[100].mxu1 }
 0x546   :  { %v4249_v62 = vpop.f32.mrb[101].mxu1 }
 0x547   :  { %v4350_v1 = vmax.f32 %v4247_v17, %v4249_v62  ;;  %v4251_v26 = vpop.f32.mrb[102].mxu1  ;;  %v6538_v17 = vld [vmem:[%s7936_s5 + $0x28] sm:$0xff]  }
 0x548   :  { %v4253_v7 = vpop.f32.mrb[103].mxu1 }
 0x549   :  { %v4364_v14 = vmax.f32 %v4348_v57, %v4350_v1  ;;  %v4351_v4 = vmax.f32 %v4251_v26, %v4253_v7 }
 0x54b   :  { %v4379_v15 = vadd.f32 %v7771_v3, %v4364_v14  ;;  %v4365_v38 = vmax.f32 %v4349_v61, %v4351_v4  ;;  %v6539_v4 = vld [vmem:[%s7936_s5 + $0x30] sm:$0xff]  }
 0x54d   :  { %v4380_v6 = vadd.f32 %v7771_v3, %v4365_v38  ;;  %v4257_v27 = vpop.f32.mrb[104].mxu1  ;;  %v4387_v39 = vmax.f32 %v4379_v15, 0.0 }
 0x54e   :  { %v4259_v28 = vpop.f32.mrb[105].mxu1 }
 0x54f   :  { %v4388_v63 = vmax.f32 %v4380_v6, 0.0  ;;  %v4352_v36 = vmax.f32 %v4257_v27, %v4259_v28  ;;  %v4261_v41 = vpop.f32.mrb[106].mxu1  ;;  %v6540_v28 = vld [vmem:[%s7936_s5 + $0x38] sm:$0xff]  }
 0x550   :  { %v4263_v2 = vpop.f32.mrb[107].mxu1 }
 0x551   :  { %v7775_v42 = vpack.c.bf16 %v4388_v63, %v4387_v39  ;;  %v4353_v8 = vmax.f32 %v4261_v41, %v4263_v2  ;;  %v6541_v41 = vld [vmem:[%s7936_s5 + $0x80] sm:$0xff]  }
 0x555   :  { %v4267_v5 = vpop.f32.mrb[108].mxu1 }
 0x556   :  { %v4269_v29 = vpop.f32.mrb[109].mxu1 }
 0x557   :  { %v4354_v50 = vmax.f32 %v4267_v5, %v4269_v29  ;;  %v4271_v47 = vpop.f32.mrb[110].mxu1  ;;  %v6545_v5 = vld [vmem:[%s7936_s5 + $0xa0] sm:$0xff]   ;;  %v6546_v29 = vld [vmem:[%s7936_s5 + $0xa8] sm:$0xff]  }
 0x558   :  { %v4273_v58 = vpop.f32.mrb[111].mxu1 }
 0x559   :  { %v4366_v0 = vmax.f32 %v4352_v36, %v4354_v50  ;;  %v4355_v40 = vmax.f32 %v4271_v47, %v4273_v58  ;;  %v6547_v50 = vld [vmem:[%s7936_s5 + $0xb0] sm:$0xff]   ;;  %v6548_v47 = vld [vmem:[%s7936_s5 + $0xb8] sm:$0xff]   ;;  %v6549_v58 = vld [vmem:[%s7936_s5 + $0xc0] sm:$0xff]  }
 0x55b   :  { %v4381_v43 = vadd.f32 %v7771_v3, %v4366_v0  ;;  %v4367_v31 = vmax.f32 %v4353_v8, %v4355_v40  ;;  %v6542_v8 = vld [vmem:[%s7936_s5 + $0x88] sm:$0xff]   ;;  %v6551_v40 = vld [vmem:[%s7936_s5 + $0xd0] sm:$0xff]  }
 0x55c   :  { %v6550_v0 = vld [vmem:[%s7936_s5 + $0xc8] sm:$0xff]  }
 0x55d   :  { %v4382_v44 = vadd.f32 %v7771_v3, %v4367_v31  ;;  %v4277_v18 = vpop.f32.mrb[112].mxu1  ;;  %v4389_v19 = vmax.f32 %v4381_v43, 0.0  ;;  %v6552_v43 = vld [vmem:[%s7936_s5 + $0xd8] sm:$0xff]   ;;  %v6553_v31 = vld [vmem:[%s7936_s5 + $0xe0] sm:$0xff]  }
 0x55e   :  { %v4279_v46 = vpop.f32.mrb[113].mxu1 }
 0x55f   :  { %v4390_v10 = vmax.f32 %v4382_v44, 0.0  ;;  %v4356_v20 = vmax.f32 %v4277_v18, %v4279_v46  ;;  %v4281_v48 = vpop.f32.mrb[114].mxu1  ;;  %v6554_v44 = vld [vmem:[%s7936_s5 + $0xe8] sm:$0xff]   ;;  %v6555_v18 = vld [vmem:[%s7936_s5 + $0xf0] sm:$0xff]   ;;  %v6556_v46 = vld [vmem:[%s7936_s5 + $0xf8] sm:$0xff]  }
 0x560   :  { %v4283_v56 = vpop.f32.mrb[115].mxu1 }
 0x561   :  { %v4396_v11 = vpack.c.bf16 %v4390_v10, %v4389_v19  ;;  %v4357_v32 = vmax.f32 %v4281_v48, %v4283_v56  ;;  %v6557_v19 = vld [vmem:[%s7938_s7] sm:$0xff]   ;;  %v6558_v10 = vld [vmem:[%s7938_s7 + $0x8] sm:$0xff]   ;;  %v6560_v48 = vld [vmem:[%s7938_s7 + $0x18] sm:$0xff]  }
 0x562   :  { %v6561_v56 = vld [vmem:[%s7938_s7 + $0x20] sm:$0xff]  }
 0x563   :  { %5649 = vmatmul.mubr.bf16.vlgmr.msra.gmra.mrb[128].mxu1 %v4396_v11  ;;  %v6563_v11 = vld [vmem:[%s7938_s7 + $0x30] sm:$0xff]  }
 0x564   :  { %5653 = vmatpush3.bf16.msra.mxu1 %v6533_v12  ;;  %5668 = vmatprep.mubr.msk.bf16.mxu1 %vm6622_vm2, %v6621_v35  ;;  %v6562_v12 = vld [vmem:[%s7938_s7 + $0x28] sm:$0xff]  }
 0x565   :  { %v4287_v52 = vpop.f32.mrb[116].mxu1  ;;  %5654 = vmatprep.subr.bf16.mxu1 %v6621_v35 }
 0x566   :  { %v4289_v9 = vpop.f32.mrb[117].mxu1 }
 0x567   :  { %v4358_v60 = vmax.f32 %v4287_v52, %v4289_v9  ;;  %v4291_v22 = vpop.f32.mrb[118].mxu1 }
 0x568   :  { %5655 = vmatpush3.bf16.msra.mxu1 %v6534_v33  ;;  %v4293_v53 = vpop.f32.mrb[119].mxu1 }
 0x569   :  { %v4368_v55 = vmax.f32 %v4356_v20, %v4358_v60  ;;  %v4359_v34 = vmax.f32 %v4291_v22, %v4293_v53  ;;  %5656 = vmatprep.subr.bf16.mxu1 %v6621_v35  ;;  %v6559_v20 = vld [vmem:[%s7938_s7 + $0x10] sm:$0xff]  }
 0x56b   :  { %v4383_v23 = vadd.f32 %v7771_v3, %v4368_v55  ;;  %v4369_v49 = vmax.f32 %v4357_v32, %v4359_v34  ;;  %v6564_v32 = vld [vmem:[%s7938_s7 + $0x38] sm:$0xff]  }
 0x56c   :  { %5657 = vmatpush3.bf16.msra.mxu1 %v6535_v54 }
 0x56d   :  { %v4384_v24 = vadd.f32 %v7771_v3, %v4369_v49  ;;  %v4297_v30 = vpop.f32.mrb[120].mxu1  ;;  %5658 = vmatprep.subr.bf16.mxu1 %v6621_v35  ;;  %v4391_v21 = vmax.f32 %v4383_v23, 0.0 }
 0x56e   :  { %v4299_v37 = vpop.f32.mrb[121].mxu1 }
 0x56f   :  { %v4392_v51 = vmax.f32 %v4384_v24, 0.0  ;;  %v4360_v16 = vmax.f32 %v4297_v30, %v4299_v37  ;;  %v4301_v45 = vpop.f32.mrb[122].mxu1 }
 0x570   :  { %5659 = vmatpush3.bf16.msra.mxu1 %v6536_v25  ;;  %v4303_v57 = vpop.f32.mrb[123].mxu1 }
 0x571   :  { %v4397_v59 = vpack.c.bf16 %v4392_v51, %v4391_v21  ;;  %v4361_v61 = vmax.f32 %v4301_v45, %v4303_v57  ;;  %5660 = vmatprep.subr.bf16.mxu1 %v6621_v35  ;;  %v5577_v51 = vld [vmem:[%s7937_s6] ss:$0 sm:$0xff] }
 0x574   :  { %5661 = vmatpush3.bf16.msra.mxu1 %v6537_v13 }
 0x575   :  { %v4307_v62 = vpop.f32.mrb[124].mxu1  ;;  %5662 = vmatprep.subr.bf16.mxu1 %v6621_v35 }
 0x576   :  { %v4309_v1 = vpop.f32.mrb[125].mxu1 }
 0x577   :  { %v4362_v26 = vmax.f32 %v4307_v62, %v4309_v1  ;;  %v4311_v7 = vpop.f32.mrb[126].mxu1 }
 0x578   :  { %5663 = vmatpush3.bf16.msra.mxu1 %v6538_v17  ;;  %v4313_v14 = vpop.f32.mrb[127].mxu1 }
 0x579   :  { %v4370_v15 = vmax.f32 %v4360_v16, %v4362_v26  ;;  %v4363_v38 = vmax.f32 %v4311_v7, %v4313_v14  ;;  %5664 = vmatprep.subr.bf16.mxu1 %v6621_v35  ;;  %v5578_v7 = vld [vmem:[%s7939_s8] ss:$0 sm:$0xff] }
 0x57b   :  { %v4385_v6 = vadd.f32 %v7771_v3, %v4370_v15  ;;  %v4371_v27 = vmax.f32 %v4361_v61, %v4363_v38 }
 0x57c   :  { %5665 = vmatpush3.bf16.msra.mxu1 %v6539_v4 }
 0x57d   :  { %v4386_v39 = vadd.f32 %v7771_v3, %v4371_v27  ;;  %5666 = vmatprep.subr.bf16.mxu1 %v6621_v35  ;;  %v4393_v63 = vmax.f32 %v4385_v6, 0.0  ;;  %v6543_v3 = vld [vmem:[%s7936_s5 + $0x90] sm:$0xff]  }
 0x57f   :  { %v4394_v36 = vmax.f32 %v4386_v39, 0.0 }
 0x580   :  { %5667 = vmatpush3.bf16.msra.mxu1 %v6540_v28 }
 0x581   :  { %v4398_v2 = vpack.c.bf16 %v4394_v36, %v4393_v63  ;;  %5672 = vmatprep.subr.bf16.mxu1 %v6621_v35 }
 0x583   :  { %5669 = vmatmul.mubr.bf16.vlgmr.msra.gmra.mrb[132].mxu1 %v7775_v42  ;;  %v6544_v42 = vld [vmem:[%s7936_s5 + $0x98] sm:$0xff]  }
 0x584   :  { %5673 = vmatpush3.bf16.msra.mxu1 %v6541_v41  ;;  %5688 = vmatprep.mubr.msk.bf16.mxu1 %vm6622_vm2, %v6621_v35 }
 0x585   :  { %5674 = vmatprep.subr.bf16.mxu1 %v6621_v35 }
 0x588   :  { %5675 = vmatpush3.bf16.msra.mxu1 %v6542_v8 }
 0x589   :  { %5676 = vmatprep.subr.bf16.mxu1 %v6621_v35 }
 0x58c   :  { %5677 = vmatpush3.bf16.msra.mxu1 %v6543_v3 }
 0x58d   :  { %5678 = vmatprep.subr.bf16.mxu1 %v6621_v35 }
 0x590   :  { %5679 = vmatpush3.bf16.msra.mxu1 %v6544_v42 }
 0x591   :  { %5680 = vmatprep.subr.bf16.mxu1 %v6621_v35 }
 0x594   :  { %5681 = vmatpush3.bf16.msra.mxu1 %v6545_v5 }
 0x595   :  { %5682 = vmatprep.subr.bf16.mxu1 %v6621_v35 }
 0x598   :  { %5683 = vmatpush3.bf16.msra.mxu1 %v6546_v29 }
 0x599   :  { %5684 = vmatprep.subr.bf16.mxu1 %v6621_v35 }
 0x59c   :  { %5685 = vmatpush3.bf16.msra.mxu1 %v6547_v50 }
 0x59d   :  { %5686 = vmatprep.subr.bf16.mxu1 %v6621_v35 }
 0x5a0   :  { %5687 = vmatpush3.bf16.msra.mxu1 %v6548_v47 }
 0x5a1   :  { %5692 = vmatprep.subr.bf16.mxu1 %v6621_v35 }
 0x5a3   :  { %5689 = vmatmul.mubr.bf16.vlgmr.msra.gmra.mrb[136].mxu1 %v4397_v59 }
 0x5a4   :  { %5693 = vmatpush3.bf16.msra.mxu1 %v6549_v58  ;;  %5708 = vmatprep.mubr.msk.bf16.mxu1 %vm6622_vm2, %v6621_v35 }
 0x5a5   :  { %5694 = vmatprep.subr.bf16.mxu1 %v6621_v35 }
 0x5a8   :  { %5695 = vmatpush3.bf16.msra.mxu1 %v6550_v0 }
 0x5a9   :  { %5696 = vmatprep.subr.bf16.mxu1 %v6621_v35 }
 0x5ac   :  { %5697 = vmatpush3.bf16.msra.mxu1 %v6551_v40 }
 0x5ad   :  { %5698 = vmatprep.subr.bf16.mxu1 %v6621_v35 }
 0x5b0   :  { %5699 = vmatpush3.bf16.msra.mxu1 %v6552_v43 }
 0x5b1   :  { %5700 = vmatprep.subr.bf16.mxu1 %v6621_v35 }
 0x5b4   :  { %5701 = vmatpush3.bf16.msra.mxu1 %v6553_v31 }
 0x5b5   :  { %5702 = vmatprep.subr.bf16.mxu1 %v6621_v35 }
 0x5b8   :  { %5703 = vmatpush3.bf16.msra.mxu1 %v6554_v44 }
 0x5b9   :  { %5704 = vmatprep.subr.bf16.mxu1 %v6621_v35 }
 0x5bc   :  { %5705 = vmatpush3.bf16.msra.mxu1 %v6555_v18 }
 0x5bd   :  { %5706 = vmatprep.subr.bf16.mxu1 %v6621_v35 }
 0x5c0   :  { %5707 = vmatpush3.bf16.msra.mxu1 %v6556_v46 }
 0x5c1   :  { %5712 = vmatprep.subr.bf16.mxu1 %v6621_v35 }
 0x5c3   :  { %5709 = vmatmul.mubr.bf16.vlgmr.msra.gmra.mrb[140].mxu1 %v4398_v2 }
 0x5c4   :  { %5728 = vmatprep.mubr.msk.bf16.mxu1 %vm6622_vm2, %v6621_v35  ;;  %5713 = vmatpush3.bf16.msra.mxu1 %v6557_v19 }
 0x5c5   :  { %5714 = vmatprep.subr.bf16.mxu1 %v6621_v35 }
 0x5c8   :  { %5715 = vmatpush3.bf16.msra.mxu1 %v6558_v10 }
 0x5c9   :  { %5716 = vmatprep.subr.bf16.mxu1 %v6621_v35 }
 0x5cc   :  { %5717 = vmatpush3.bf16.msra.mxu1 %v6559_v20 }
 0x5cd   :  { %5718 = vmatprep.subr.bf16.mxu1 %v6621_v35 }
 0x5d0   :  { %5719 = vmatpush3.bf16.msra.mxu1 %v6560_v48 }
 0x5d1   :  { %5720 = vmatprep.subr.bf16.mxu1 %v6621_v35 }
 0x5d4   :  { %5721 = vmatpush3.bf16.msra.mxu1 %v6561_v56 }
 0x5d5   :  { %5722 = vmatprep.subr.bf16.mxu1 %v6621_v35 }
 0x5d8   :  { %5723 = vmatpush3.bf16.msra.mxu1 %v6562_v12 }
 0x5d9   :  { %5724 = vmatprep.subr.bf16.mxu1 %v6621_v35 }
 0x5dc   :  { %5725 = vmatpush3.bf16.msra.mxu1 %v6563_v11 }
 0x5dd   :  { %5726 = vmatprep.subr.bf16.mxu1 %v6621_v35 }
 0x5e0   :  { %5727 = vmatpush3.bf16.msra.mxu1 %v6564_v32 }
 0x636   :  { %v4514_v33 = vpop.f32.mrb[128].mxu1 }
 0x637   :  { %v5650_v52 = vpop.f32.mrb[129].mxu1 }
 0x638   :  { %v4517_v9 = vpop.f32.mrb[130].mxu1 }
 0x639   :  { %v5651_v60 = vpop.f32.mrb[131].mxu1 }
 0x656   :  { %v4603_v22 = vpop.f32.mrb[132].mxu1 }
 0x657   :  { %v4604_v53 = vadd.f32 %v4603_v22, %v4514_v33  ;;  %v5670_v54 = vpop.f32.mrb[133].mxu1 }
 0x658   :  { %v4606_v55 = vpop.f32.mrb[134].mxu1 }
 0x659   :  { %v4607_v34 = vadd.f32 %v4606_v55, %v4517_v9  ;;  %v5671_v23 = vpop.f32.mrb[135].mxu1 }
 0x676   :  { %v4709_v49 = vpop.f32.mrb[136].mxu1 }
 0x677   :  { %v4716_v25 = vadd.f32 %v4709_v49, %v4604_v53  ;;  %v5690_v24 = vpop.f32.mrb[137].mxu1 }
 0x678   :  { %v4712_v30 = vpop.f32.mrb[138].mxu1 }
 0x679   :  { %v4717_v35 = vadd.f32 %v4712_v30, %v4607_v34  ;;  %v5691_v37 = vpop.f32.mrb[139].mxu1 }
 0x696   :  { %v4817_v21 = vpop.f32.mrb[140].mxu1 }
 0x697   :  { %v4824_v16 = vadd.f32 %v4817_v21, %v4716_v25  ;;  %v5710_v45 = vpop.f32.mrb[141].mxu1 }
 0x698   :  { %v4820_v57 = vpop.f32.mrb[142].mxu1 }
 0x699   :  { %v4833_v13 = vadd.f32 %v5577_v51, %v4824_v16  ;;  %v4825_v59 = vadd.f32 %v4820_v57, %v4717_v35  ;;  %v5711_v61 = vpop.f32.mrb[143].mxu1 }
 0x69b   :  { %v4834_v17 = vadd.f32 %v5577_v51, %v4825_v59  ;;  %v4835_v62 = vmax.f32 %v4833_v13, 0.0 }
 0x69d   :  { %v4836_v1 = vmax.f32 %v4834_v17, 0.0 }
 0x69f   :  { %v4837_v26 = vpack.c.bf16 %v4836_v1, %v4835_v62 }
 0x6a1   :  { %5729 = vmatmul.mubr.bf16.vlgmr.msra.gmra.mrb[144].mxu1 %v4837_v26 }
 0x774   :  { %v4943_v14 = vpop.f32.mrb[144].mxu1 }
 0x775   :  { %v4944_v4 = vadd.f32 %v5578_v7, %v4943_v14  ;;  %v5730_v15 = vpop.f32.mrb[145].mxu1 }
 0x776   :  { %v4946_v38 = vpop.f32.mrb[146].mxu1 }
 0x777   :  { %4950 = vst [vmem:[%s7940_s9] sm:$0xff] %v4944_v4  ;;  %v4947_v6 = vadd.f32 %v5578_v7, %v4946_v38  ;;  %v5731_v27 = vpop.f32.mrb[147].mxu1 }
 0x779   :  { %4951 = vst [vmem:[%s7940_s9 + $0x8] sm:$0xff] %v4947_v6 }
 0x77a   :  { %4956 = vsyncpa [#allocation3], 1 }
 0x77b   :  { %4957 = vsyncpa [#allocation5], 1 }

</bundles_post_ra>
